<compile_context>
chip_gen: v6e
topology: v6e:2x2x1
jax: 0.10.0
libtpu: 0.0.40
codegen_flags: <defaults>
</compile_context>

<pallas_src>
import functools
import math

import jax
import jax.numpy as jnp
from jax.experimental import pallas as pl
from jax.experimental.pallas import tpu as pltpu

# ---- mini-BERT config ----
VOCAB = 100
HIDDEN = 32
N_HEADS = 4
HEAD_DIM = HIDDEN // N_HEADS
N_LAYERS = 2
INTERMEDIATE = 64
MAX_POS = 16
TYPE_VOCAB = 2
NUM_CLASSES = 2
LN_EPS = 1e-12
MASK_NEG = -1e9


# ---------------- in-kernel helpers ----------------
def _layernorm(x, g, b):
    mu = jnp.mean(x, axis=-1, keepdims=True)
    var = jnp.mean((x - mu) ** 2, axis=-1, keepdims=True)
    return (x - mu) * jax.lax.rsqrt(var + LN_EPS) * g + b


def _gelu(x):
    # TODO(synk): HF BERT uses exact erf-GELU; tanh approximation used here (EUP-friendly).
    c = math.sqrt(2.0 / math.pi)
    return 0.5 * x * (1.0 + jnp.tanh(c * (x + 0.044715 * x * x * x)))


def _mm(a, w):
    # MXU matmul: bf16 operands, f32 accumulation; elementwise math stays f32.
    return jnp.dot(a.astype(jnp.bfloat16), w, preferred_element_type=jnp.float32)


# ---------------- fused forward kernel ----------------
def bert_fused_kernel(x_ref, bias_ref, emb_g_ref, emb_b_ref,
                      wqkv_ref, bqkv_ref, wo_ref, bo_ref,
                      g1_ref, b1_ref, wi_ref, bi_ref, wh_ref, bh_ref, g2_ref, b2_ref,
                      wp_ref, bp_ref, wf_ref, bf_ref,
                      o_ref, *, n_layers, n_heads, batch, seq):
    H = emb_g_ref.shape[-1]
    hd = H // n_heads

    # embeddings LayerNorm (word+pos+type already summed in the wrapper)
    x = _layernorm(x_ref[...], emb_g_ref[...], emb_b_ref[...])        # (B*S, H) f32
    bias = bias_ref[...]                                               # (B, 1, S) additive mask

    for l in range(n_layers):                                          # static unroll; weights VMEM-resident
        wqkv, bqkv = wqkv_ref[l], bqkv_ref[l]
        wo, bo = wo_ref[l], bo_ref[l]
        wi, bi = wi_ref[l], bi_ref[l]
        wh, bh = wh_ref[l], bh_ref[l]
        g1, b1 = g1_ref[l], b1_ref[l]
        g2, b2 = g2_ref[l], b2_ref[l]

        # ---- multi-head self-attention ----
        # fused QKV projection; Wq/bq are pre-scaled by 1/sqrt(hd) outside the kernel
        qkv = _mm(x, wqkv) + bqkv                                      # (B*S, 3H) f32

        attn = None
        for h in range(n_heads):                                       # heads unrolled, batches packed per contraction
            qh = qkv[:, h * hd:(h + 1) * hd].reshape(batch, seq, hd).astype(jnp.bfloat16)
            kh = qkv[:, H + h * hd:H + (h + 1) * hd].reshape(batch, seq, hd).astype(jnp.bfloat16)
            vh = qkv[:, 2 * H + h * hd:2 * H + (h + 1) * hd].reshape(batch, seq, hd).astype(jnp.bfloat16)
            s = jnp.einsum('bqd,bkd->bqk', qh, kh,
                           preferred_element_type=jnp.float32) + bias  # (B, S, S) f32
            m = jnp.max(s, axis=-1, keepdims=True)
            e = jnp.exp(s - m)
            p = e * pl.reciprocal(jnp.sum(e, axis=-1, keepdims=True), approx=True)
            ctx = jnp.einsum('bqk,bkd->bqd', p.astype(jnp.bfloat16), vh,
                             preferred_element_type=jnp.float32)       # (B, S, hd) f32
            # fold the per-head output straight into the Wo projection (stays in vregs,
            # no VMEM scratch round trip):  attn @ Wo == sum_h ctx_h @ Wo[h*hd:(h+1)*hd, :]
            part = jnp.dot(ctx.reshape(batch * seq, hd).astype(jnp.bfloat16),
                           wo[h * hd:(h + 1) * hd, :], preferred_element_type=jnp.float32)
            attn = part if attn is None else attn + part
        attn = attn + bo
        x = _layernorm(x + attn, g1, b1)

        # ---- feed-forward ----
        ff = _gelu(_mm(x, wi) + bi)
        ff = _mm(ff, wh) + bh
        x = _layernorm(x + ff, g2, b2)

    # ---- pooler on [CLS] token + dropout(identity, eval mode) + fc ----
    cls = x.reshape(batch, seq, H)[:, 0, :]                            # (B, H)
    pooled = jnp.tanh(_mm(cls, wp_ref[...]) + bp_ref[...])
    o_ref[...] = _mm(pooled, wf_ref[...]) + bf_ref[...]                # (B, NUM_CLASSES)


# ---------------- pallas_call wrapper ----------------
def bert_classifier_forward(params, input_ids, attention_mask):
    B, S = input_ids.shape
    word = jnp.take(params['word_emb'], input_ids, axis=0)             # (B, S, H) gather in plain JAX
    pos = params['pos_emb'][:S][None, :, :]                            # (1, S, H)
    typ = params['type_emb'][0][None, None, :]                         # token_type_ids == 0
    x = (word + pos + typ).astype(jnp.float32).reshape(B * S, HIDDEN)  # flatten in the wrapper (free)

    # additive attention-mask bias hoisted out of the kernel: (B, 1, S), 0 = keep, -1e9 = pad
    mask_bias = (1.0 - attention_mask.astype(jnp.float32))[:, None, :] * MASK_NEG

    # stack per-layer params along a leading layer axis, indexed with a static l in-kernel
    stacked = tuple(jnp.stack(t) for t in zip(*params['layers']))
    wp, bp = params['pooler']
    wf, bf = params['fc']

    args = (x, mask_bias, params['emb_ln_g'], params['emb_ln_b'],
            *stacked, wp, bp, wf, bf)

    kernel = functools.partial(bert_fused_kernel, n_layers=N_LAYERS,
                               n_heads=N_HEADS, batch=B, seq=S)
    return pl.pallas_call(
        kernel,
        out_shape=jax.ShapeDtypeStruct((B, NUM_CLASSES), jnp.float32),
        in_specs=[pl.BlockSpec(memory_space=pltpu.MemorySpace.VMEM)] * len(args),
        out_specs=pl.BlockSpec(memory_space=pltpu.MemorySpace.VMEM),
    )(*args)


# ---------------- parameters ----------------
def init_params(key):
    def dense(k, fan_in, fan_out):
        k1, k2 = jax.random.split(k)
        # matmul weights in bf16 (MXU inputs); biases / LN params stay f32
        w = (jax.random.normal(k1, (fan_in, fan_out), jnp.float32) * 0.02).astype(jnp.bfloat16)
        b = jax.random.normal(k2, (1, fan_out), jnp.float32) * 0.02
        return w, b

    attn_scale = 1.0 / math.sqrt(HEAD_DIM)

    keys = jax.random.split(key, 5 + N_LAYERS)
    params = {
        'word_emb': jax.random.normal(keys[0], (VOCAB, HIDDEN), jnp.float32) * 0.02,
        'pos_emb': jax.random.normal(keys[1], (MAX_POS, HIDDEN), jnp.float32) * 0.02,
        'type_emb': jax.random.normal(keys[2], (TYPE_VOCAB, HIDDEN), jnp.float32) * 0.02,
        'emb_ln_g': jnp.ones((1, HIDDEN), jnp.float32),
        'emb_ln_b': jnp.zeros((1, HIDDEN), jnp.float32),
    }
    layers = []
    for l in range(N_LAYERS):
        lk = jax.random.split(keys[3 + l], 6)
        wq, bq = dense(lk[0], HIDDEN, HIDDEN)
        wk, bk = dense(lk[1], HIDDEN, HIDDEN)
        wv, bv = dense(lk[2], HIDDEN, HIDDEN)
        # fold the attention scale into Wq/bq, then fuse QKV into a single (H, 3H) weight
        wq_s = (wq.astype(jnp.float32) * attn_scale).astype(jnp.bfloat16)
        bq_s = bq * attn_scale
        wqkv = jnp.concatenate([wq_s, wk, wv], axis=1)                 # (H, 3H) bf16
        bqkv = jnp.concatenate([bq_s, bk, bv], axis=1)                 # (1, 3H) f32
        wo, bo = dense(lk[3], HIDDEN, HIDDEN)
        wi, bi = dense(lk[4], HIDDEN, INTERMEDIATE)
        wh, bh = dense(lk[5], INTERMEDIATE, HIDDEN)
        g1 = jnp.ones((1, HIDDEN), jnp.float32)
        b1 = jnp.zeros((1, HIDDEN), jnp.float32)
        g2 = jnp.ones((1, HIDDEN), jnp.float32)
        b2 = jnp.zeros((1, HIDDEN), jnp.float32)
        layers.append((wqkv, bqkv, wo, bo,
                       g1, b1, wi, bi, wh, bh, g2, b2))
    params['layers'] = layers
    params['pooler'] = dense(keys[3 + N_LAYERS], HIDDEN, HIDDEN)
    params['fc'] = dense(keys[4 + N_LAYERS], HIDDEN, NUM_CLASSES)
    return params


if __name__ == "__main__":
    key = jax.random.PRNGKey(0)
    pkey, ikey = jax.random.split(key)
    params = init_params(pkey)

    B, S = 2, 8
    input_ids = jax.random.randint(ikey, (B, S), 0, VOCAB, dtype=jnp.int32)
    attention_mask = jnp.ones((B, S), dtype=jnp.int32)

    logits = bert_classifier_forward(params, input_ids, attention_mask)
    jax.block_until_ready(logits)
    assert logits.shape == (B, NUM_CLASSES) and logits.dtype == jnp.float32
    print("KERNEL_OK")
</pallas_src>

<mosaic_0001>
module attributes {stable_mosaic.version = 11 : i64} {
  func.func @bert_fused_kernel(%arg0: memref<16x32xf32, #tpu.memory_space<vmem>>, %arg1: memref<2x1x8xf32, #tpu.memory_space<vmem>>, %arg2: memref<1x32xf32, #tpu.memory_space<vmem>>, %arg3: memref<1x32xf32, #tpu.memory_space<vmem>>, %arg4: memref<2x32x96xbf16, #tpu.memory_space<vmem>>, %arg5: memref<2x1x96xf32, #tpu.memory_space<vmem>>, %arg6: memref<2x32x32xbf16, #tpu.memory_space<vmem>>, %arg7: memref<2x1x32xf32, #tpu.memory_space<vmem>>, %arg8: memref<2x1x32xf32, #tpu.memory_space<vmem>>, %arg9: memref<2x1x32xf32, #tpu.memory_space<vmem>>, %arg10: memref<2x32x64xbf16, #tpu.memory_space<vmem>>, %arg11: memref<2x1x64xf32, #tpu.memory_space<vmem>>, %arg12: memref<2x64x32xbf16, #tpu.memory_space<vmem>>, %arg13: memref<2x1x32xf32, #tpu.memory_space<vmem>>, %arg14: memref<2x1x32xf32, #tpu.memory_space<vmem>>, %arg15: memref<2x1x32xf32, #tpu.memory_space<vmem>>, %arg16: memref<32x32xbf16, #tpu.memory_space<vmem>>, %arg17: memref<1x32xf32, #tpu.memory_space<vmem>>, %arg18: memref<32x2xbf16, #tpu.memory_space<vmem>>, %arg19: memref<1x2xf32, #tpu.memory_space<vmem>>, %arg20: memref<2x2xf32, #tpu.memory_space<vmem>>) attributes {dimension_semantics = [], scalar_prefetch = 0 : i64, scratch_operands = 0 : i64, tpu.core_type = #tpu.core_type<tc>} {
    %c0 = arith.constant 0 : index
    %c0_0 = arith.constant 0 : index
    %0 = vector.load %arg0[%c0, %c0_0] : memref<16x32xf32, #tpu.memory_space<vmem>>, vector<16x32xf32>
    %c0_1 = arith.constant 0 : index
    %c0_2 = arith.constant 0 : index
    %1 = vector.load %arg2[%c0_1, %c0_2] : memref<1x32xf32, #tpu.memory_space<vmem>>, vector<1x32xf32>
    %c0_3 = arith.constant 0 : index
    %c0_4 = arith.constant 0 : index
    %2 = vector.load %arg3[%c0_3, %c0_4] : memref<1x32xf32, #tpu.memory_space<vmem>>, vector<1x32xf32>
    %cst = arith.constant dense<0.000000e+00> : vector<16xf32>
    %3 = vector.multi_reduction <add>, %0, %cst [1] : vector<16x32xf32> to vector<16xf32>
    %4 = vector.shape_cast %3 : vector<16xf32> to vector<16x1xf32>
    %cst_5 = arith.constant 3.200000e+01 : f32
    %5 = vector.broadcast %cst_5 : f32 to vector<16x1xf32>
    %6 = arith.divf %4, %5 : vector<16x1xf32>
    %7 = vector.broadcast %6 : vector<16x1xf32> to vector<16x32xf32>
    %8 = arith.subf %0, %7 : vector<16x32xf32>
    %9 = arith.mulf %8, %8 : vector<16x32xf32>
    %cst_6 = arith.constant dense<0.000000e+00> : vector<16xf32>
    %10 = vector.multi_reduction <add>, %9, %cst_6 [1] : vector<16x32xf32> to vector<16xf32>
    %11 = vector.shape_cast %10 : vector<16xf32> to vector<16x1xf32>
    %cst_7 = arith.constant 3.200000e+01 : f32
    %12 = vector.broadcast %cst_7 : f32 to vector<16x1xf32>
    %13 = arith.divf %11, %12 : vector<16x1xf32>
    %14 = vector.broadcast %6 : vector<16x1xf32> to vector<16x32xf32>
    %15 = arith.subf %0, %14 : vector<16x32xf32>
    %cst_8 = arith.constant 9.99999996E-13 : f32
    %16 = vector.broadcast %cst_8 : f32 to vector<16x1xf32>
    %17 = arith.addf %13, %16 : vector<16x1xf32>
    %18 = math.rsqrt %17 : vector<16x1xf32>
    %19 = vector.broadcast %18 : vector<16x1xf32> to vector<16x32xf32>
    %20 = arith.mulf %15, %19 : vector<16x32xf32>
    %21 = vector.broadcast %1 : vector<1x32xf32> to vector<16x32xf32>
    %22 = arith.mulf %20, %21 : vector<16x32xf32>
    %23 = vector.broadcast %2 : vector<1x32xf32> to vector<16x32xf32>
    %24 = arith.addf %22, %23 : vector<16x32xf32>
    %c0_9 = arith.constant 0 : index
    %c0_10 = arith.constant 0 : index
    %c0_11 = arith.constant 0 : index
    %25 = vector.load %arg1[%c0_9, %c0_10, %c0_11] : memref<2x1x8xf32, #tpu.memory_space<vmem>>, vector<2x1x8xf32>
    %c0_12 = arith.constant 0 : index
    %c0_13 = arith.constant 0 : index
    %c0_14 = arith.constant 0 : index
    %26 = vector.load %arg4[%c0_12, %c0_13, %c0_14] : memref<2x32x96xbf16, #tpu.memory_space<vmem>>, vector<1x32x96xbf16>
    %27 = vector.shape_cast %26 : vector<1x32x96xbf16> to vector<32x96xbf16>
    %c0_15 = arith.constant 0 : index
    %c0_16 = arith.constant 0 : index
    %c0_17 = arith.constant 0 : index
    %28 = vector.load %arg5[%c0_15, %c0_16, %c0_17] : memref<2x1x96xf32, #tpu.memory_space<vmem>>, vector<1x1x96xf32>
    %29 = vector.shape_cast %28 : vector<1x1x96xf32> to vector<1x96xf32>
    %c0_18 = arith.constant 0 : index
    %c0_19 = arith.constant 0 : index
    %c0_20 = arith.constant 0 : index
    %30 = vector.load %arg6[%c0_18, %c0_19, %c0_20] : memref<2x32x32xbf16, #tpu.memory_space<vmem>>, vector<1x32x32xbf16>
    %31 = vector.shape_cast %30 : vector<1x32x32xbf16> to vector<32x32xbf16>
    %c0_21 = arith.constant 0 : index
    %c0_22 = arith.constant 0 : index
    %c0_23 = arith.constant 0 : index
    %32 = vector.load %arg7[%c0_21, %c0_22, %c0_23] : memref<2x1x32xf32, #tpu.memory_space<vmem>>, vector<1x1x32xf32>
    %33 = vector.shape_cast %32 : vector<1x1x32xf32> to vector<1x32xf32>
    %c0_24 = arith.constant 0 : index
    %c0_25 = arith.constant 0 : index
    %c0_26 = arith.constant 0 : index
    %34 = vector.load %arg10[%c0_24, %c0_25, %c0_26] : memref<2x32x64xbf16, #tpu.memory_space<vmem>>, vector<1x32x64xbf16>
    %35 = vector.shape_cast %34 : vector<1x32x64xbf16> to vector<32x64xbf16>
    %c0_27 = arith.constant 0 : index
    %c0_28 = arith.constant 0 : index
    %c0_29 = arith.constant 0 : index
    %36 = vector.load %arg11[%c0_27, %c0_28, %c0_29] : memref<2x1x64xf32, #tpu.memory_space<vmem>>, vector<1x1x64xf32>
    %37 = vector.shape_cast %36 : vector<1x1x64xf32> to vector<1x64xf32>
    %c0_30 = arith.constant 0 : index
    %c0_31 = arith.constant 0 : index
    %c0_32 = arith.constant 0 : index
    %38 = vector.load %arg12[%c0_30, %c0_31, %c0_32] : memref<2x64x32xbf16, #tpu.memory_space<vmem>>, vector<1x64x32xbf16>
    %39 = vector.shape_cast %38 : vector<1x64x32xbf16> to vector<64x32xbf16>
    %c0_33 = arith.constant 0 : index
    %c0_34 = arith.constant 0 : index
    %c0_35 = arith.constant 0 : index
    %40 = vector.load %arg13[%c0_33, %c0_34, %c0_35] : memref<2x1x32xf32, #tpu.memory_space<vmem>>, vector<1x1x32xf32>
    %41 = vector.shape_cast %40 : vector<1x1x32xf32> to vector<1x32xf32>
    %c0_36 = arith.constant 0 : index
    %c0_37 = arith.constant 0 : index
    %c0_38 = arith.constant 0 : index
    %42 = vector.load %arg8[%c0_36, %c0_37, %c0_38] : memref<2x1x32xf32, #tpu.memory_space<vmem>>, vector<1x1x32xf32>
    %43 = vector.shape_cast %42 : vector<1x1x32xf32> to vector<1x32xf32>
    %c0_39 = arith.constant 0 : index
    %c0_40 = arith.constant 0 : index
    %c0_41 = arith.constant 0 : index
    %44 = vector.load %arg9[%c0_39, %c0_40, %c0_41] : memref<2x1x32xf32, #tpu.memory_space<vmem>>, vector<1x1x32xf32>
    %45 = vector.shape_cast %44 : vector<1x1x32xf32> to vector<1x32xf32>
    %c0_42 = arith.constant 0 : index
    %c0_43 = arith.constant 0 : index
    %c0_44 = arith.constant 0 : index
    %46 = vector.load %arg14[%c0_42, %c0_43, %c0_44] : memref<2x1x32xf32, #tpu.memory_space<vmem>>, vector<1x1x32xf32>
    %47 = vector.shape_cast %46 : vector<1x1x32xf32> to vector<1x32xf32>
    %c0_45 = arith.constant 0 : index
    %c0_46 = arith.constant 0 : index
    %c0_47 = arith.constant 0 : index
    %48 = vector.load %arg15[%c0_45, %c0_46, %c0_47] : memref<2x1x32xf32, #tpu.memory_space<vmem>>, vector<1x1x32xf32>
    %49 = vector.shape_cast %48 : vector<1x1x32xf32> to vector<1x32xf32>
    %50 = arith.truncf %24 : vector<16x32xf32> to vector<16x32xbf16>
    %cst_48 = arith.constant dense<0.000000e+00> : vector<16x96xf32>
    %51 = tpu.matmul %50, %27, %cst_48 {dimension_numbers = #tpu.dot_dimension_numbers<[1], [0], [0], [1], [0, 0, 1, 1], [], []>} : vector<16x32xbf16>, vector<32x96xbf16>, vector<16x96xf32> -> vector<16x96xf32>
    %52 = vector.broadcast %29 : vector<1x96xf32> to vector<16x96xf32>
    %53 = arith.addf %51, %52 : vector<16x96xf32>
    %54 = vector.extract_strided_slice %53 {offsets = [0, 0], sizes = [16, 8], strides = [1, 1]} : vector<16x96xf32> to vector<16x8xf32>
    %55 = vector.shape_cast %54 : vector<16x8xf32> to vector<2x8x8xf32>
    %56 = arith.truncf %55 : vector<2x8x8xf32> to vector<2x8x8xbf16>
    %57 = vector.extract_strided_slice %53 {offsets = [0, 32], sizes = [16, 8], strides = [1, 1]} : vector<16x96xf32> to vector<16x8xf32>
    %58 = vector.shape_cast %57 : vector<16x8xf32> to vector<2x8x8xf32>
    %59 = arith.truncf %58 : vector<2x8x8xf32> to vector<2x8x8xbf16>
    %60 = vector.extract_strided_slice %53 {offsets = [0, 64], sizes = [16, 8], strides = [1, 1]} : vector<16x96xf32> to vector<16x8xf32>
    %61 = vector.shape_cast %60 : vector<16x8xf32> to vector<2x8x8xf32>
    %62 = arith.truncf %61 : vector<2x8x8xf32> to vector<2x8x8xbf16>
    "tpu.trace_start"() <{level = 10 : i32, message = "bqd,bkd->bqk"}> : () -> ()
    %cst_49 = arith.constant dense<0.000000e+00> : vector<2x8x8xf32>
    %63 = tpu.matmul %56, %59, %cst_49 {dimension_numbers = #tpu.dot_dimension_numbers<[2], [2], [1], [1], [0, 0, 0, 1, 1, 1], [0], [0]>} : vector<2x8x8xbf16>, vector<2x8x8xbf16>, vector<2x8x8xf32> -> vector<2x8x8xf32>
    "tpu.trace_stop"() : () -> ()
    %64 = vector.broadcast %25 : vector<2x1x8xf32> to vector<2x8x8xf32>
    %65 = arith.addf %63, %64 : vector<2x8x8xf32>
    %cst_50 = arith.constant dense<0xFF800000> : vector<2x8xf32>
    %66 = vector.multi_reduction <maximumf>, %65, %cst_50 [2] : vector<2x8x8xf32> to vector<2x8xf32>
    %67 = vector.shape_cast %66 : vector<2x8xf32> to vector<2x8x1xf32>
    %68 = vector.broadcast %67 : vector<2x8x1xf32> to vector<2x8x8xf32>
    %69 = arith.subf %65, %68 : vector<2x8x8xf32>
    %70 = math.exp %69 : vector<2x8x8xf32>
    %cst_51 = arith.constant dense<0.000000e+00> : vector<2x8xf32>
    %71 = vector.multi_reduction <add>, %70, %cst_51 [2] : vector<2x8x8xf32> to vector<2x8xf32>
    %72 = vector.shape_cast %71 : vector<2x8xf32> to vector<2x8x1xf32>
    %73 = tpu.reciprocal %72 {approx = true} : vector<2x8x1xf32> -> vector<2x8x1xf32>
    %74 = vector.broadcast %73 : vector<2x8x1xf32> to vector<2x8x8xf32>
    %75 = arith.mulf %70, %74 : vector<2x8x8xf32>
    %76 = arith.truncf %75 : vector<2x8x8xf32> to vector<2x8x8xbf16>
    "tpu.trace_start"() <{level = 10 : i32, message = "bqk,bkd->bqd"}> : () -> ()
    %cst_52 = arith.constant dense<0.000000e+00> : vector<2x8x8xf32>
    %77 = tpu.matmul %76, %62, %cst_52 {dimension_numbers = #tpu.dot_dimension_numbers<[2], [1], [1], [2], [0, 0, 0, 1, 1, 2], [0], [0]>} : vector<2x8x8xbf16>, vector<2x8x8xbf16>, vector<2x8x8xf32> -> vector<2x8x8xf32>
    "tpu.trace_stop"() : () -> ()
    %78 = vector.shape_cast %77 : vector<2x8x8xf32> to vector<16x8xf32>
    %79 = arith.truncf %78 : vector<16x8xf32> to vector<16x8xbf16>
    %80 = vector.extract_strided_slice %31 {offsets = [0, 0], sizes = [8, 32], strides = [1, 1]} : vector<32x32xbf16> to vector<8x32xbf16>
    %cst_53 = arith.constant dense<0.000000e+00> : vector<16x32xf32>
    %81 = tpu.matmul %79, %80, %cst_53 {dimension_numbers = #tpu.dot_dimension_numbers<[1], [0], [0], [1], [0, 0, 1, 1], [], []>} : vector<16x8xbf16>, vector<8x32xbf16>, vector<16x32xf32> -> vector<16x32xf32>
    %82 = vector.extract_strided_slice %53 {offsets = [0, 8], sizes = [16, 8], strides = [1, 1]} : vector<16x96xf32> to vector<16x8xf32>
    %83 = vector.shape_cast %82 : vector<16x8xf32> to vector<2x8x8xf32>
    %84 = arith.truncf %83 : vector<2x8x8xf32> to vector<2x8x8xbf16>
    %85 = vector.extract_strided_slice %53 {offsets = [0, 40], sizes = [16, 8], strides = [1, 1]} : vector<16x96xf32> to vector<16x8xf32>
    %86 = vector.shape_cast %85 : vector<16x8xf32> to vector<2x8x8xf32>
    %87 = arith.truncf %86 : vector<2x8x8xf32> to vector<2x8x8xbf16>
    %88 = vector.extract_strided_slice %53 {offsets = [0, 72], sizes = [16, 8], strides = [1, 1]} : vector<16x96xf32> to vector<16x8xf32>
    %89 = vector.shape_cast %88 : vector<16x8xf32> to vector<2x8x8xf32>
    %90 = arith.truncf %89 : vector<2x8x8xf32> to vector<2x8x8xbf16>
    "tpu.trace_start"() <{level = 10 : i32, message = "bqd,bkd->bqk"}> : () -> ()
    %cst_54 = arith.constant dense<0.000000e+00> : vector<2x8x8xf32>
    %91 = tpu.matmul %84, %87, %cst_54 {dimension_numbers = #tpu.dot_dimension_numbers<[2], [2], [1], [1], [0, 0, 0, 1, 1, 1], [0], [0]>} : vector<2x8x8xbf16>, vector<2x8x8xbf16>, vector<2x8x8xf32> -> vector<2x8x8xf32>
    "tpu.trace_stop"() : () -> ()
    %92 = vector.broadcast %25 : vector<2x1x8xf32> to vector<2x8x8xf32>
    %93 = arith.addf %91, %92 : vector<2x8x8xf32>
    %cst_55 = arith.constant dense<0xFF800000> : vector<2x8xf32>
    %94 = vector.multi_reduction <maximumf>, %93, %cst_55 [2] : vector<2x8x8xf32> to vector<2x8xf32>
    %95 = vector.shape_cast %94 : vector<2x8xf32> to vector<2x8x1xf32>
    %96 = vector.broadcast %95 : vector<2x8x1xf32> to vector<2x8x8xf32>
    %97 = arith.subf %93, %96 : vector<2x8x8xf32>
    %98 = math.exp %97 : vector<2x8x8xf32>
    %cst_56 = arith.constant dense<0.000000e+00> : vector<2x8xf32>
    %99 = vector.multi_reduction <add>, %98, %cst_56 [2] : vector<2x8x8xf32> to vector<2x8xf32>
    %100 = vector.shape_cast %99 : vector<2x8xf32> to vector<2x8x1xf32>
    %101 = tpu.reciprocal %100 {approx = true} : vector<2x8x1xf32> -> vector<2x8x1xf32>
    %102 = vector.broadcast %101 : vector<2x8x1xf32> to vector<2x8x8xf32>
    %103 = arith.mulf %98, %102 : vector<2x8x8xf32>
    %104 = arith.truncf %103 : vector<2x8x8xf32> to vector<2x8x8xbf16>
    "tpu.trace_start"() <{level = 10 : i32, message = "bqk,bkd->bqd"}> : () -> ()
    %cst_57 = arith.constant dense<0.000000e+00> : vector<2x8x8xf32>
    %105 = tpu.matmul %104, %90, %cst_57 {dimension_numbers = #tpu.dot_dimension_numbers<[2], [1], [1], [2], [0, 0, 0, 1, 1, 2], [0], [0]>} : vector<2x8x8xbf16>, vector<2x8x8xbf16>, vector<2x8x8xf32> -> vector<2x8x8xf32>
    "tpu.trace_stop"() : () -> ()
    %106 = vector.shape_cast %105 : vector<2x8x8xf32> to vector<16x8xf32>
    %107 = arith.truncf %106 : vector<16x8xf32> to vector<16x8xbf16>
    %108 = vector.extract_strided_slice %31 {offsets = [8, 0], sizes = [8, 32], strides = [1, 1]} : vector<32x32xbf16> to vector<8x32xbf16>
    %cst_58 = arith.constant dense<0.000000e+00> : vector<16x32xf32>
    %109 = tpu.matmul %107, %108, %cst_58 {dimension_numbers = #tpu.dot_dimension_numbers<[1], [0], [0], [1], [0, 0, 1, 1], [], []>} : vector<16x8xbf16>, vector<8x32xbf16>, vector<16x32xf32> -> vector<16x32xf32>
    %110 = arith.addf %81, %109 : vector<16x32xf32>
    %111 = vector.extract_strided_slice %53 {offsets = [0, 16], sizes = [16, 8], strides = [1, 1]} : vector<16x96xf32> to vector<16x8xf32>
    %112 = vector.shape_cast %111 : vector<16x8xf32> to vector<2x8x8xf32>
    %113 = arith.truncf %112 : vector<2x8x8xf32> to vector<2x8x8xbf16>
    %114 = vector.extract_strided_slice %53 {offsets = [0, 48], sizes = [16, 8], strides = [1, 1]} : vector<16x96xf32> to vector<16x8xf32>
    %115 = vector.shape_cast %114 : vector<16x8xf32> to vector<2x8x8xf32>
    %116 = arith.truncf %115 : vector<2x8x8xf32> to vector<2x8x8xbf16>
    %117 = vector.extract_strided_slice %53 {offsets = [0, 80], sizes = [16, 8], strides = [1, 1]} : vector<16x96xf32> to vector<16x8xf32>
    %118 = vector.shape_cast %117 : vector<16x8xf32> to vector<2x8x8xf32>
    %119 = arith.truncf %118 : vector<2x8x8xf32> to vector<2x8x8xbf16>
    "tpu.trace_start"() <{level = 10 : i32, message = "bqd,bkd->bqk"}> : () -> ()
    %cst_59 = arith.constant dense<0.000000e+00> : vector<2x8x8xf32>
    %120 = tpu.matmul %113, %116, %cst_59 {dimension_numbers = #tpu.dot_dimension_numbers<[2], [2], [1], [1], [0, 0, 0, 1, 1, 1], [0], [0]>} : vector<2x8x8xbf16>, vector<2x8x8xbf16>, vector<2x8x8xf32> -> vector<2x8x8xf32>
    "tpu.trace_stop"() : () -> ()
    %121 = vector.broadcast %25 : vector<2x1x8xf32> to vector<2x8x8xf32>
    %122 = arith.addf %120, %121 : vector<2x8x8xf32>
    %cst_60 = arith.constant dense<0xFF800000> : vector<2x8xf32>
    %123 = vector.multi_reduction <maximumf>, %122, %cst_60 [2] : vector<2x8x8xf32> to vector<2x8xf32>
    %124 = vector.shape_cast %123 : vector<2x8xf32> to vector<2x8x1xf32>
    %125 = vector.broadcast %124 : vector<2x8x1xf32> to vector<2x8x8xf32>
    %126 = arith.subf %122, %125 : vector<2x8x8xf32>
    %127 = math.exp %126 : vector<2x8x8xf32>
    %cst_61 = arith.constant dense<0.000000e+00> : vector<2x8xf32>
    %128 = vector.multi_reduction <add>, %127, %cst_61 [2] : vector<2x8x8xf32> to vector<2x8xf32>
    %129 = vector.shape_cast %128 : vector<2x8xf32> to vector<2x8x1xf32>
    %130 = tpu.reciprocal %129 {approx = true} : vector<2x8x1xf32> -> vector<2x8x1xf32>
    %131 = vector.broadcast %130 : vector<2x8x1xf32> to vector<2x8x8xf32>
    %132 = arith.mulf %127, %131 : vector<2x8x8xf32>
    %133 = arith.truncf %132 : vector<2x8x8xf32> to vector<2x8x8xbf16>
    "tpu.trace_start"() <{level = 10 : i32, message = "bqk,bkd->bqd"}> : () -> ()
    %cst_62 = arith.constant dense<0.000000e+00> : vector<2x8x8xf32>
    %134 = tpu.matmul %133, %119, %cst_62 {dimension_numbers = #tpu.dot_dimension_numbers<[2], [1], [1], [2], [0, 0, 0, 1, 1, 2], [0], [0]>} : vector<2x8x8xbf16>, vector<2x8x8xbf16>, vector<2x8x8xf32> -> vector<2x8x8xf32>
    "tpu.trace_stop"() : () -> ()
    %135 = vector.shape_cast %134 : vector<2x8x8xf32> to vector<16x8xf32>
    %136 = arith.truncf %135 : vector<16x8xf32> to vector<16x8xbf16>
    %137 = vector.extract_strided_slice %31 {offsets = [16, 0], sizes = [8, 32], strides = [1, 1]} : vector<32x32xbf16> to vector<8x32xbf16>
    %cst_63 = arith.constant dense<0.000000e+00> : vector<16x32xf32>
    %138 = tpu.matmul %136, %137, %cst_63 {dimension_numbers = #tpu.dot_dimension_numbers<[1], [0], [0], [1], [0, 0, 1, 1], [], []>} : vector<16x8xbf16>, vector<8x32xbf16>, vector<16x32xf32> -> vector<16x32xf32>
    %139 = arith.addf %110, %138 : vector<16x32xf32>
    %140 = vector.extract_strided_slice %53 {offsets = [0, 24], sizes = [16, 8], strides = [1, 1]} : vector<16x96xf32> to vector<16x8xf32>
    %141 = vector.shape_cast %140 : vector<16x8xf32> to vector<2x8x8xf32>
    %142 = arith.truncf %141 : vector<2x8x8xf32> to vector<2x8x8xbf16>
    %143 = vector.extract_strided_slice %53 {offsets = [0, 56], sizes = [16, 8], strides = [1, 1]} : vector<16x96xf32> to vector<16x8xf32>
    %144 = vector.shape_cast %143 : vector<16x8xf32> to vector<2x8x8xf32>
    %145 = arith.truncf %144 : vector<2x8x8xf32> to vector<2x8x8xbf16>
    %146 = vector.extract_strided_slice %53 {offsets = [0, 88], sizes = [16, 8], strides = [1, 1]} : vector<16x96xf32> to vector<16x8xf32>
    %147 = vector.shape_cast %146 : vector<16x8xf32> to vector<2x8x8xf32>
    %148 = arith.truncf %147 : vector<2x8x8xf32> to vector<2x8x8xbf16>
    "tpu.trace_start"() <{level = 10 : i32, message = "bqd,bkd->bqk"}> : () -> ()
    %cst_64 = arith.constant dense<0.000000e+00> : vector<2x8x8xf32>
    %149 = tpu.matmul %142, %145, %cst_64 {dimension_numbers = #tpu.dot_dimension_numbers<[2], [2], [1], [1], [0, 0, 0, 1, 1, 1], [0], [0]>} : vector<2x8x8xbf16>, vector<2x8x8xbf16>, vector<2x8x8xf32> -> vector<2x8x8xf32>
    "tpu.trace_stop"() : () -> ()
    %150 = vector.broadcast %25 : vector<2x1x8xf32> to vector<2x8x8xf32>
    %151 = arith.addf %149, %150 : vector<2x8x8xf32>
    %cst_65 = arith.constant dense<0xFF800000> : vector<2x8xf32>
    %152 = vector.multi_reduction <maximumf>, %151, %cst_65 [2] : vector<2x8x8xf32> to vector<2x8xf32>
    %153 = vector.shape_cast %152 : vector<2x8xf32> to vector<2x8x1xf32>
    %154 = vector.broadcast %153 : vector<2x8x1xf32> to vector<2x8x8xf32>
    %155 = arith.subf %151, %154 : vector<2x8x8xf32>
    %156 = math.exp %155 : vector<2x8x8xf32>
    %cst_66 = arith.constant dense<0.000000e+00> : vector<2x8xf32>
    %157 = vector.multi_reduction <add>, %156, %cst_66 [2] : vector<2x8x8xf32> to vector<2x8xf32>
    %158 = vector.shape_cast %157 : vector<2x8xf32> to vector<2x8x1xf32>
    %159 = tpu.reciprocal %158 {approx = true} : vector<2x8x1xf32> -> vector<2x8x1xf32>
    %160 = vector.broadcast %159 : vector<2x8x1xf32> to vector<2x8x8xf32>
    %161 = arith.mulf %156, %160 : vector<2x8x8xf32>
    %162 = arith.truncf %161 : vector<2x8x8xf32> to vector<2x8x8xbf16>
    "tpu.trace_start"() <{level = 10 : i32, message = "bqk,bkd->bqd"}> : () -> ()
    %cst_67 = arith.constant dense<0.000000e+00> : vector<2x8x8xf32>
    %163 = tpu.matmul %162, %148, %cst_67 {dimension_numbers = #tpu.dot_dimension_numbers<[2], [1], [1], [2], [0, 0, 0, 1, 1, 2], [0], [0]>} : vector<2x8x8xbf16>, vector<2x8x8xbf16>, vector<2x8x8xf32> -> vector<2x8x8xf32>
    "tpu.trace_stop"() : () -> ()
    %164 = vector.shape_cast %163 : vector<2x8x8xf32> to vector<16x8xf32>
    %165 = arith.truncf %164 : vector<16x8xf32> to vector<16x8xbf16>
    %166 = vector.extract_strided_slice %31 {offsets = [24, 0], sizes = [8, 32], strides = [1, 1]} : vector<32x32xbf16> to vector<8x32xbf16>
    %cst_68 = arith.constant dense<0.000000e+00> : vector<16x32xf32>
    %167 = tpu.matmul %165, %166, %cst_68 {dimension_numbers = #tpu.dot_dimension_numbers<[1], [0], [0], [1], [0, 0, 1, 1], [], []>} : vector<16x8xbf16>, vector<8x32xbf16>, vector<16x32xf32> -> vector<16x32xf32>
    %168 = arith.addf %139, %167 : vector<16x32xf32>
    %169 = vector.broadcast %33 : vector<1x32xf32> to vector<16x32xf32>
    %170 = arith.addf %168, %169 : vector<16x32xf32>
    %171 = arith.addf %24, %170 : vector<16x32xf32>
    %cst_69 = arith.constant dense<0.000000e+00> : vector<16xf32>
    %172 = vector.multi_reduction <add>, %171, %cst_69 [1] : vector<16x32xf32> to vector<16xf32>
    %173 = vector.shape_cast %172 : vector<16xf32> to vector<16x1xf32>
    %cst_70 = arith.constant 3.200000e+01 : f32
    %174 = vector.broadcast %cst_70 : f32 to vector<16x1xf32>
    %175 = arith.divf %173, %174 : vector<16x1xf32>
    %176 = vector.broadcast %175 : vector<16x1xf32> to vector<16x32xf32>
    %177 = arith.subf %171, %176 : vector<16x32xf32>
    %178 = arith.mulf %177, %177 : vector<16x32xf32>
    %cst_71 = arith.constant dense<0.000000e+00> : vector<16xf32>
    %179 = vector.multi_reduction <add>, %178, %cst_71 [1] : vector<16x32xf32> to vector<16xf32>
    %180 = vector.shape_cast %179 : vector<16xf32> to vector<16x1xf32>
    %cst_72 = arith.constant 3.200000e+01 : f32
    %181 = vector.broadcast %cst_72 : f32 to vector<16x1xf32>
    %182 = arith.divf %180, %181 : vector<16x1xf32>
    %183 = vector.broadcast %175 : vector<16x1xf32> to vector<16x32xf32>
    %184 = arith.subf %171, %183 : vector<16x32xf32>
    %cst_73 = arith.constant 9.99999996E-13 : f32
    %185 = vector.broadcast %cst_73 : f32 to vector<16x1xf32>
    %186 = arith.addf %182, %185 : vector<16x1xf32>
    %187 = math.rsqrt %186 : vector<16x1xf32>
    %188 = vector.broadcast %187 : vector<16x1xf32> to vector<16x32xf32>
    %189 = arith.mulf %184, %188 : vector<16x32xf32>
    %190 = vector.broadcast %43 : vector<1x32xf32> to vector<16x32xf32>
    %191 = arith.mulf %189, %190 : vector<16x32xf32>
    %192 = vector.broadcast %45 : vector<1x32xf32> to vector<16x32xf32>
    %193 = arith.addf %191, %192 : vector<16x32xf32>
    %194 = arith.truncf %193 : vector<16x32xf32> to vector<16x32xbf16>
    %cst_74 = arith.constant dense<0.000000e+00> : vector<16x64xf32>
    %195 = tpu.matmul %194, %35, %cst_74 {dimension_numbers = #tpu.dot_dimension_numbers<[1], [0], [0], [1], [0, 0, 1, 1], [], []>} : vector<16x32xbf16>, vector<32x64xbf16>, vector<16x64xf32> -> vector<16x64xf32>
    %196 = vector.broadcast %37 : vector<1x64xf32> to vector<16x64xf32>
    %197 = arith.addf %195, %196 : vector<16x64xf32>
    %cst_75 = arith.constant 5.000000e-01 : f32
    %198 = vector.broadcast %cst_75 : f32 to vector<16x64xf32>
    %199 = arith.mulf %198, %197 : vector<16x64xf32>
    %cst_76 = arith.constant 4.471500e-02 : f32
    %200 = vector.broadcast %cst_76 : f32 to vector<16x64xf32>
    %201 = arith.mulf %200, %197 : vector<16x64xf32>
    %202 = arith.mulf %201, %197 : vector<16x64xf32>
    %203 = arith.mulf %202, %197 : vector<16x64xf32>
    %204 = arith.addf %197, %203 : vector<16x64xf32>
    %cst_77 = arith.constant 0.797884583 : f32
    %205 = vector.broadcast %cst_77 : f32 to vector<16x64xf32>
    %206 = arith.mulf %205, %204 : vector<16x64xf32>
    %207 = math.tanh %206 : vector<16x64xf32>
    %cst_78 = arith.constant 1.000000e+00 : f32
    %208 = vector.broadcast %cst_78 : f32 to vector<16x64xf32>
    %209 = arith.addf %208, %207 : vector<16x64xf32>
    %210 = arith.mulf %199, %209 : vector<16x64xf32>
    %211 = arith.truncf %210 : vector<16x64xf32> to vector<16x64xbf16>
    %cst_79 = arith.constant dense<0.000000e+00> : vector<16x32xf32>
    %212 = tpu.matmul %211, %39, %cst_79 {dimension_numbers = #tpu.dot_dimension_numbers<[1], [0], [0], [1], [0, 0, 1, 1], [], []>} : vector<16x64xbf16>, vector<64x32xbf16>, vector<16x32xf32> -> vector<16x32xf32>
    %213 = vector.broadcast %41 : vector<1x32xf32> to vector<16x32xf32>
    %214 = arith.addf %212, %213 : vector<16x32xf32>
    %215 = arith.addf %193, %214 : vector<16x32xf32>
    %cst_80 = arith.constant dense<0.000000e+00> : vector<16xf32>
    %216 = vector.multi_reduction <add>, %215, %cst_80 [1] : vector<16x32xf32> to vector<16xf32>
    %217 = vector.shape_cast %216 : vector<16xf32> to vector<16x1xf32>
    %cst_81 = arith.constant 3.200000e+01 : f32
    %218 = vector.broadcast %cst_81 : f32 to vector<16x1xf32>
    %219 = arith.divf %217, %218 : vector<16x1xf32>
    %220 = vector.broadcast %219 : vector<16x1xf32> to vector<16x32xf32>
    %221 = arith.subf %215, %220 : vector<16x32xf32>
    %222 = arith.mulf %221, %221 : vector<16x32xf32>
    %cst_82 = arith.constant dense<0.000000e+00> : vector<16xf32>
    %223 = vector.multi_reduction <add>, %222, %cst_82 [1] : vector<16x32xf32> to vector<16xf32>
    %224 = vector.shape_cast %223 : vector<16xf32> to vector<16x1xf32>
    %cst_83 = arith.constant 3.200000e+01 : f32
    %225 = vector.broadcast %cst_83 : f32 to vector<16x1xf32>
    %226 = arith.divf %224, %225 : vector<16x1xf32>
    %227 = vector.broadcast %219 : vector<16x1xf32> to vector<16x32xf32>
    %228 = arith.subf %215, %227 : vector<16x32xf32>
    %cst_84 = arith.constant 9.99999996E-13 : f32
    %229 = vector.broadcast %cst_84 : f32 to vector<16x1xf32>
    %230 = arith.addf %226, %229 : vector<16x1xf32>
    %231 = math.rsqrt %230 : vector<16x1xf32>
    %232 = vector.broadcast %231 : vector<16x1xf32> to vector<16x32xf32>
    %233 = arith.mulf %228, %232 : vector<16x32xf32>
    %234 = vector.broadcast %47 : vector<1x32xf32> to vector<16x32xf32>
    %235 = arith.mulf %233, %234 : vector<16x32xf32>
    %236 = vector.broadcast %49 : vector<1x32xf32> to vector<16x32xf32>
    %237 = arith.addf %235, %236 : vector<16x32xf32>
    %c1 = arith.constant 1 : index
    %c0_85 = arith.constant 0 : index
    %c0_86 = arith.constant 0 : index
    %238 = vector.load %arg4[%c1, %c0_85, %c0_86] : memref<2x32x96xbf16, #tpu.memory_space<vmem>>, vector<1x32x96xbf16>
    %239 = vector.shape_cast %238 : vector<1x32x96xbf16> to vector<32x96xbf16>
    %c1_87 = arith.constant 1 : index
    %c0_88 = arith.constant 0 : index
    %c0_89 = arith.constant 0 : index
    %240 = vector.load %arg5[%c1_87, %c0_88, %c0_89] : memref<2x1x96xf32, #tpu.memory_space<vmem>>, vector<1x1x96xf32>
    %241 = vector.shape_cast %240 : vector<1x1x96xf32> to vector<1x96xf32>
    %c1_90 = arith.constant 1 : index
    %c0_91 = arith.constant 0 : index
    %c0_92 = arith.constant 0 : index
    %242 = vector.load %arg6[%c1_90, %c0_91, %c0_92] : memref<2x32x32xbf16, #tpu.memory_space<vmem>>, vector<1x32x32xbf16>
    %243 = vector.shape_cast %242 : vector<1x32x32xbf16> to vector<32x32xbf16>
    %c1_93 = arith.constant 1 : index
    %c0_94 = arith.constant 0 : index
    %c0_95 = arith.constant 0 : index
    %244 = vector.load %arg7[%c1_93, %c0_94, %c0_95] : memref<2x1x32xf32, #tpu.memory_space<vmem>>, vector<1x1x32xf32>
    %245 = vector.shape_cast %244 : vector<1x1x32xf32> to vector<1x32xf32>
    %c1_96 = arith.constant 1 : index
    %c0_97 = arith.constant 0 : index
    %c0_98 = arith.constant 0 : index
    %246 = vector.load %arg10[%c1_96, %c0_97, %c0_98] : memref<2x32x64xbf16, #tpu.memory_space<vmem>>, vector<1x32x64xbf16>
    %247 = vector.shape_cast %246 : vector<1x32x64xbf16> to vector<32x64xbf16>
    %c1_99 = arith.constant 1 : index
    %c0_100 = arith.constant 0 : index
    %c0_101 = arith.constant 0 : index
    %248 = vector.load %arg11[%c1_99, %c0_100, %c0_101] : memref<2x1x64xf32, #tpu.memory_space<vmem>>, vector<1x1x64xf32>
    %249 = vector.shape_cast %248 : vector<1x1x64xf32> to vector<1x64xf32>
    %c1_102 = arith.constant 1 : index
    %c0_103 = arith.constant 0 : index
    %c0_104 = arith.constant 0 : index
    %250 = vector.load %arg12[%c1_102, %c0_103, %c0_104] : memref<2x64x32xbf16, #tpu.memory_space<vmem>>, vector<1x64x32xbf16>
    %251 = vector.shape_cast %250 : vector<1x64x32xbf16> to vector<64x32xbf16>
    %c1_105 = arith.constant 1 : index
    %c0_106 = arith.constant 0 : index
    %c0_107 = arith.constant 0 : index
    %252 = vector.load %arg13[%c1_105, %c0_106, %c0_107] : memref<2x1x32xf32, #tpu.memory_space<vmem>>, vector<1x1x32xf32>
    %253 = vector.shape_cast %252 : vector<1x1x32xf32> to vector<1x32xf32>
    %c1_108 = arith.constant 1 : index
    %c0_109 = arith.constant 0 : index
    %c0_110 = arith.constant 0 : index
    %254 = vector.load %arg8[%c1_108, %c0_109, %c0_110] : memref<2x1x32xf32, #tpu.memory_space<vmem>>, vector<1x1x32xf32>
    %255 = vector.shape_cast %254 : vector<1x1x32xf32> to vector<1x32xf32>
    %c1_111 = arith.constant 1 : index
    %c0_112 = arith.constant 0 : index
    %c0_113 = arith.constant 0 : index
    %256 = vector.load %arg9[%c1_111, %c0_112, %c0_113] : memref<2x1x32xf32, #tpu.memory_space<vmem>>, vector<1x1x32xf32>
    %257 = vector.shape_cast %256 : vector<1x1x32xf32> to vector<1x32xf32>
    %c1_114 = arith.constant 1 : index
    %c0_115 = arith.constant 0 : index
    %c0_116 = arith.constant 0 : index
    %258 = vector.load %arg14[%c1_114, %c0_115, %c0_116] : memref<2x1x32xf32, #tpu.memory_space<vmem>>, vector<1x1x32xf32>
    %259 = vector.shape_cast %258 : vector<1x1x32xf32> to vector<1x32xf32>
    %c1_117 = arith.constant 1 : index
    %c0_118 = arith.constant 0 : index
    %c0_119 = arith.constant 0 : index
    %260 = vector.load %arg15[%c1_117, %c0_118, %c0_119] : memref<2x1x32xf32, #tpu.memory_space<vmem>>, vector<1x1x32xf32>
    %261 = vector.shape_cast %260 : vector<1x1x32xf32> to vector<1x32xf32>
    %262 = arith.truncf %237 : vector<16x32xf32> to vector<16x32xbf16>
    %cst_120 = arith.constant dense<0.000000e+00> : vector<16x96xf32>
    %263 = tpu.matmul %262, %239, %cst_120 {dimension_numbers = #tpu.dot_dimension_numbers<[1], [0], [0], [1], [0, 0, 1, 1], [], []>} : vector<16x32xbf16>, vector<32x96xbf16>, vector<16x96xf32> -> vector<16x96xf32>
    %264 = vector.broadcast %241 : vector<1x96xf32> to vector<16x96xf32>
    %265 = arith.addf %263, %264 : vector<16x96xf32>
    %266 = vector.extract_strided_slice %265 {offsets = [0, 0], sizes = [16, 8], strides = [1, 1]} : vector<16x96xf32> to vector<16x8xf32>
    %267 = vector.shape_cast %266 : vector<16x8xf32> to vector<2x8x8xf32>
    %268 = arith.truncf %267 : vector<2x8x8xf32> to vector<2x8x8xbf16>
    %269 = vector.extract_strided_slice %265 {offsets = [0, 32], sizes = [16, 8], strides = [1, 1]} : vector<16x96xf32> to vector<16x8xf32>
    %270 = vector.shape_cast %269 : vector<16x8xf32> to vector<2x8x8xf32>
    %271 = arith.truncf %270 : vector<2x8x8xf32> to vector<2x8x8xbf16>
    %272 = vector.extract_strided_slice %265 {offsets = [0, 64], sizes = [16, 8], strides = [1, 1]} : vector<16x96xf32> to vector<16x8xf32>
    %273 = vector.shape_cast %272 : vector<16x8xf32> to vector<2x8x8xf32>
    %274 = arith.truncf %273 : vector<2x8x8xf32> to vector<2x8x8xbf16>
    "tpu.trace_start"() <{level = 10 : i32, message = "bqd,bkd->bqk"}> : () -> ()
    %cst_121 = arith.constant dense<0.000000e+00> : vector<2x8x8xf32>
    %275 = tpu.matmul %268, %271, %cst_121 {dimension_numbers = #tpu.dot_dimension_numbers<[2], [2], [1], [1], [0, 0, 0, 1, 1, 1], [0], [0]>} : vector<2x8x8xbf16>, vector<2x8x8xbf16>, vector<2x8x8xf32> -> vector<2x8x8xf32>
    "tpu.trace_stop"() : () -> ()
    %276 = vector.broadcast %25 : vector<2x1x8xf32> to vector<2x8x8xf32>
    %277 = arith.addf %275, %276 : vector<2x8x8xf32>
    %cst_122 = arith.constant dense<0xFF800000> : vector<2x8xf32>
    %278 = vector.multi_reduction <maximumf>, %277, %cst_122 [2] : vector<2x8x8xf32> to vector<2x8xf32>
    %279 = vector.shape_cast %278 : vector<2x8xf32> to vector<2x8x1xf32>
    %280 = vector.broadcast %279 : vector<2x8x1xf32> to vector<2x8x8xf32>
    %281 = arith.subf %277, %280 : vector<2x8x8xf32>
    %282 = math.exp %281 : vector<2x8x8xf32>
    %cst_123 = arith.constant dense<0.000000e+00> : vector<2x8xf32>
    %283 = vector.multi_reduction <add>, %282, %cst_123 [2] : vector<2x8x8xf32> to vector<2x8xf32>
    %284 = vector.shape_cast %283 : vector<2x8xf32> to vector<2x8x1xf32>
    %285 = tpu.reciprocal %284 {approx = true} : vector<2x8x1xf32> -> vector<2x8x1xf32>
    %286 = vector.broadcast %285 : vector<2x8x1xf32> to vector<2x8x8xf32>
    %287 = arith.mulf %282, %286 : vector<2x8x8xf32>
    %288 = arith.truncf %287 : vector<2x8x8xf32> to vector<2x8x8xbf16>
    "tpu.trace_start"() <{level = 10 : i32, message = "bqk,bkd->bqd"}> : () -> ()
    %cst_124 = arith.constant dense<0.000000e+00> : vector<2x8x8xf32>
    %289 = tpu.matmul %288, %274, %cst_124 {dimension_numbers = #tpu.dot_dimension_numbers<[2], [1], [1], [2], [0, 0, 0, 1, 1, 2], [0], [0]>} : vector<2x8x8xbf16>, vector<2x8x8xbf16>, vector<2x8x8xf32> -> vector<2x8x8xf32>
    "tpu.trace_stop"() : () -> ()
    %290 = vector.shape_cast %289 : vector<2x8x8xf32> to vector<16x8xf32>
    %291 = arith.truncf %290 : vector<16x8xf32> to vector<16x8xbf16>
    %292 = vector.extract_strided_slice %243 {offsets = [0, 0], sizes = [8, 32], strides = [1, 1]} : vector<32x32xbf16> to vector<8x32xbf16>
    %cst_125 = arith.constant dense<0.000000e+00> : vector<16x32xf32>
    %293 = tpu.matmul %291, %292, %cst_125 {dimension_numbers = #tpu.dot_dimension_numbers<[1], [0], [0], [1], [0, 0, 1, 1], [], []>} : vector<16x8xbf16>, vector<8x32xbf16>, vector<16x32xf32> -> vector<16x32xf32>
    %294 = vector.extract_strided_slice %265 {offsets = [0, 8], sizes = [16, 8], strides = [1, 1]} : vector<16x96xf32> to vector<16x8xf32>
    %295 = vector.shape_cast %294 : vector<16x8xf32> to vector<2x8x8xf32>
    %296 = arith.truncf %295 : vector<2x8x8xf32> to vector<2x8x8xbf16>
    %297 = vector.extract_strided_slice %265 {offsets = [0, 40], sizes = [16, 8], strides = [1, 1]} : vector<16x96xf32> to vector<16x8xf32>
    %298 = vector.shape_cast %297 : vector<16x8xf32> to vector<2x8x8xf32>
    %299 = arith.truncf %298 : vector<2x8x8xf32> to vector<2x8x8xbf16>
    %300 = vector.extract_strided_slice %265 {offsets = [0, 72], sizes = [16, 8], strides = [1, 1]} : vector<16x96xf32> to vector<16x8xf32>
    %301 = vector.shape_cast %300 : vector<16x8xf32> to vector<2x8x8xf32>
    %302 = arith.truncf %301 : vector<2x8x8xf32> to vector<2x8x8xbf16>
    "tpu.trace_start"() <{level = 10 : i32, message = "bqd,bkd->bqk"}> : () -> ()
    %cst_126 = arith.constant dense<0.000000e+00> : vector<2x8x8xf32>
    %303 = tpu.matmul %296, %299, %cst_126 {dimension_numbers = #tpu.dot_dimension_numbers<[2], [2], [1], [1], [0, 0, 0, 1, 1, 1], [0], [0]>} : vector<2x8x8xbf16>, vector<2x8x8xbf16>, vector<2x8x8xf32> -> vector<2x8x8xf32>
    "tpu.trace_stop"() : () -> ()
    %304 = vector.broadcast %25 : vector<2x1x8xf32> to vector<2x8x8xf32>
    %305 = arith.addf %303, %304 : vector<2x8x8xf32>
    %cst_127 = arith.constant dense<0xFF800000> : vector<2x8xf32>
    %306 = vector.multi_reduction <maximumf>, %305, %cst_127 [2] : vector<2x8x8xf32> to vector<2x8xf32>
    %307 = vector.shape_cast %306 : vector<2x8xf32> to vector<2x8x1xf32>
    %308 = vector.broadcast %307 : vector<2x8x1xf32> to vector<2x8x8xf32>
    %309 = arith.subf %305, %308 : vector<2x8x8xf32>
    %310 = math.exp %309 : vector<2x8x8xf32>
    %cst_128 = arith.constant dense<0.000000e+00> : vector<2x8xf32>
    %311 = vector.multi_reduction <add>, %310, %cst_128 [2] : vector<2x8x8xf32> to vector<2x8xf32>
    %312 = vector.shape_cast %311 : vector<2x8xf32> to vector<2x8x1xf32>
    %313 = tpu.reciprocal %312 {approx = true} : vector<2x8x1xf32> -> vector<2x8x1xf32>
    %314 = vector.broadcast %313 : vector<2x8x1xf32> to vector<2x8x8xf32>
    %315 = arith.mulf %310, %314 : vector<2x8x8xf32>
    %316 = arith.truncf %315 : vector<2x8x8xf32> to vector<2x8x8xbf16>
    "tpu.trace_start"() <{level = 10 : i32, message = "bqk,bkd->bqd"}> : () -> ()
    %cst_129 = arith.constant dense<0.000000e+00> : vector<2x8x8xf32>
    %317 = tpu.matmul %316, %302, %cst_129 {dimension_numbers = #tpu.dot_dimension_numbers<[2], [1], [1], [2], [0, 0, 0, 1, 1, 2], [0], [0]>} : vector<2x8x8xbf16>, vector<2x8x8xbf16>, vector<2x8x8xf32> -> vector<2x8x8xf32>
    "tpu.trace_stop"() : () -> ()
    %318 = vector.shape_cast %317 : vector<2x8x8xf32> to vector<16x8xf32>
    %319 = arith.truncf %318 : vector<16x8xf32> to vector<16x8xbf16>
    %320 = vector.extract_strided_slice %243 {offsets = [8, 0], sizes = [8, 32], strides = [1, 1]} : vector<32x32xbf16> to vector<8x32xbf16>
    %cst_130 = arith.constant dense<0.000000e+00> : vector<16x32xf32>
    %321 = tpu.matmul %319, %320, %cst_130 {dimension_numbers = #tpu.dot_dimension_numbers<[1], [0], [0], [1], [0, 0, 1, 1], [], []>} : vector<16x8xbf16>, vector<8x32xbf16>, vector<16x32xf32> -> vector<16x32xf32>
    %322 = arith.addf %293, %321 : vector<16x32xf32>
    %323 = vector.extract_strided_slice %265 {offsets = [0, 16], sizes = [16, 8], strides = [1, 1]} : vector<16x96xf32> to vector<16x8xf32>
    %324 = vector.shape_cast %323 : vector<16x8xf32> to vector<2x8x8xf32>
    %325 = arith.truncf %324 : vector<2x8x8xf32> to vector<2x8x8xbf16>
    %326 = vector.extract_strided_slice %265 {offsets = [0, 48], sizes = [16, 8], strides = [1, 1]} : vector<16x96xf32> to vector<16x8xf32>
    %327 = vector.shape_cast %326 : vector<16x8xf32> to vector<2x8x8xf32>
    %328 = arith.truncf %327 : vector<2x8x8xf32> to vector<2x8x8xbf16>
    %329 = vector.extract_strided_slice %265 {offsets = [0, 80], sizes = [16, 8], strides = [1, 1]} : vector<16x96xf32> to vector<16x8xf32>
    %330 = vector.shape_cast %329 : vector<16x8xf32> to vector<2x8x8xf32>
    %331 = arith.truncf %330 : vector<2x8x8xf32> to vector<2x8x8xbf16>
    "tpu.trace_start"() <{level = 10 : i32, message = "bqd,bkd->bqk"}> : () -> ()
    %cst_131 = arith.constant dense<0.000000e+00> : vector<2x8x8xf32>
    %332 = tpu.matmul %325, %328, %cst_131 {dimension_numbers = #tpu.dot_dimension_numbers<[2], [2], [1], [1], [0, 0, 0, 1, 1, 1], [0], [0]>} : vector<2x8x8xbf16>, vector<2x8x8xbf16>, vector<2x8x8xf32> -> vector<2x8x8xf32>
    "tpu.trace_stop"() : () -> ()
    %333 = vector.broadcast %25 : vector<2x1x8xf32> to vector<2x8x8xf32>
    %334 = arith.addf %332, %333 : vector<2x8x8xf32>
    %cst_132 = arith.constant dense<0xFF800000> : vector<2x8xf32>
    %335 = vector.multi_reduction <maximumf>, %334, %cst_132 [2] : vector<2x8x8xf32> to vector<2x8xf32>
    %336 = vector.shape_cast %335 : vector<2x8xf32> to vector<2x8x1xf32>
    %337 = vector.broadcast %336 : vector<2x8x1xf32> to vector<2x8x8xf32>
    %338 = arith.subf %334, %337 : vector<2x8x8xf32>
    %339 = math.exp %338 : vector<2x8x8xf32>
    %cst_133 = arith.constant dense<0.000000e+00> : vector<2x8xf32>
    %340 = vector.multi_reduction <add>, %339, %cst_133 [2] : vector<2x8x8xf32> to vector<2x8xf32>
    %341 = vector.shape_cast %340 : vector<2x8xf32> to vector<2x8x1xf32>
    %342 = tpu.reciprocal %341 {approx = true} : vector<2x8x1xf32> -> vector<2x8x1xf32>
    %343 = vector.broadcast %342 : vector<2x8x1xf32> to vector<2x8x8xf32>
    %344 = arith.mulf %339, %343 : vector<2x8x8xf32>
    %345 = arith.truncf %344 : vector<2x8x8xf32> to vector<2x8x8xbf16>
    "tpu.trace_start"() <{level = 10 : i32, message = "bqk,bkd->bqd"}> : () -> ()
    %cst_134 = arith.constant dense<0.000000e+00> : vector<2x8x8xf32>
    %346 = tpu.matmul %345, %331, %cst_134 {dimension_numbers = #tpu.dot_dimension_numbers<[2], [1], [1], [2], [0, 0, 0, 1, 1, 2], [0], [0]>} : vector<2x8x8xbf16>, vector<2x8x8xbf16>, vector<2x8x8xf32> -> vector<2x8x8xf32>
    "tpu.trace_stop"() : () -> ()
    %347 = vector.shape_cast %346 : vector<2x8x8xf32> to vector<16x8xf32>
    %348 = arith.truncf %347 : vector<16x8xf32> to vector<16x8xbf16>
    %349 = vector.extract_strided_slice %243 {offsets = [16, 0], sizes = [8, 32], strides = [1, 1]} : vector<32x32xbf16> to vector<8x32xbf16>
    %cst_135 = arith.constant dense<0.000000e+00> : vector<16x32xf32>
    %350 = tpu.matmul %348, %349, %cst_135 {dimension_numbers = #tpu.dot_dimension_numbers<[1], [0], [0], [1], [0, 0, 1, 1], [], []>} : vector<16x8xbf16>, vector<8x32xbf16>, vector<16x32xf32> -> vector<16x32xf32>
    %351 = arith.addf %322, %350 : vector<16x32xf32>
    %352 = vector.extract_strided_slice %265 {offsets = [0, 24], sizes = [16, 8], strides = [1, 1]} : vector<16x96xf32> to vector<16x8xf32>
    %353 = vector.shape_cast %352 : vector<16x8xf32> to vector<2x8x8xf32>
    %354 = arith.truncf %353 : vector<2x8x8xf32> to vector<2x8x8xbf16>
    %355 = vector.extract_strided_slice %265 {offsets = [0, 56], sizes = [16, 8], strides = [1, 1]} : vector<16x96xf32> to vector<16x8xf32>
    %356 = vector.shape_cast %355 : vector<16x8xf32> to vector<2x8x8xf32>
    %357 = arith.truncf %356 : vector<2x8x8xf32> to vector<2x8x8xbf16>
    %358 = vector.extract_strided_slice %265 {offsets = [0, 88], sizes = [16, 8], strides = [1, 1]} : vector<16x96xf32> to vector<16x8xf32>
    %359 = vector.shape_cast %358 : vector<16x8xf32> to vector<2x8x8xf32>
    %360 = arith.truncf %359 : vector<2x8x8xf32> to vector<2x8x8xbf16>
    "tpu.trace_start"() <{level = 10 : i32, message = "bqd,bkd->bqk"}> : () -> ()
    %cst_136 = arith.constant dense<0.000000e+00> : vector<2x8x8xf32>
    %361 = tpu.matmul %354, %357, %cst_136 {dimension_numbers = #tpu.dot_dimension_numbers<[2], [2], [1], [1], [0, 0, 0, 1, 1, 1], [0], [0]>} : vector<2x8x8xbf16>, vector<2x8x8xbf16>, vector<2x8x8xf32> -> vector<2x8x8xf32>
    "tpu.trace_stop"() : () -> ()
    %362 = vector.broadcast %25 : vector<2x1x8xf32> to vector<2x8x8xf32>
    %363 = arith.addf %361, %362 : vector<2x8x8xf32>
    %cst_137 = arith.constant dense<0xFF800000> : vector<2x8xf32>
    %364 = vector.multi_reduction <maximumf>, %363, %cst_137 [2] : vector<2x8x8xf32> to vector<2x8xf32>
    %365 = vector.shape_cast %364 : vector<2x8xf32> to vector<2x8x1xf32>
    %366 = vector.broadcast %365 : vector<2x8x1xf32> to vector<2x8x8xf32>
    %367 = arith.subf %363, %366 : vector<2x8x8xf32>
    %368 = math.exp %367 : vector<2x8x8xf32>
    %cst_138 = arith.constant dense<0.000000e+00> : vector<2x8xf32>
    %369 = vector.multi_reduction <add>, %368, %cst_138 [2] : vector<2x8x8xf32> to vector<2x8xf32>
    %370 = vector.shape_cast %369 : vector<2x8xf32> to vector<2x8x1xf32>
    %371 = tpu.reciprocal %370 {approx = true} : vector<2x8x1xf32> -> vector<2x8x1xf32>
    %372 = vector.broadcast %371 : vector<2x8x1xf32> to vector<2x8x8xf32>
    %373 = arith.mulf %368, %372 : vector<2x8x8xf32>
    %374 = arith.truncf %373 : vector<2x8x8xf32> to vector<2x8x8xbf16>
    "tpu.trace_start"() <{level = 10 : i32, message = "bqk,bkd->bqd"}> : () -> ()
    %cst_139 = arith.constant dense<0.000000e+00> : vector<2x8x8xf32>
    %375 = tpu.matmul %374, %360, %cst_139 {dimension_numbers = #tpu.dot_dimension_numbers<[2], [1], [1], [2], [0, 0, 0, 1, 1, 2], [0], [0]>} : vector<2x8x8xbf16>, vector<2x8x8xbf16>, vector<2x8x8xf32> -> vector<2x8x8xf32>
    "tpu.trace_stop"() : () -> ()
    %376 = vector.shape_cast %375 : vector<2x8x8xf32> to vector<16x8xf32>
    %377 = arith.truncf %376 : vector<16x8xf32> to vector<16x8xbf16>
    %378 = vector.extract_strided_slice %243 {offsets = [24, 0], sizes = [8, 32], strides = [1, 1]} : vector<32x32xbf16> to vector<8x32xbf16>
    %cst_140 = arith.constant dense<0.000000e+00> : vector<16x32xf32>
    %379 = tpu.matmul %377, %378, %cst_140 {dimension_numbers = #tpu.dot_dimension_numbers<[1], [0], [0], [1], [0, 0, 1, 1], [], []>} : vector<16x8xbf16>, vector<8x32xbf16>, vector<16x32xf32> -> vector<16x32xf32>
    %380 = arith.addf %351, %379 : vector<16x32xf32>
    %381 = vector.broadcast %245 : vector<1x32xf32> to vector<16x32xf32>
    %382 = arith.addf %380, %381 : vector<16x32xf32>
    %383 = arith.addf %237, %382 : vector<16x32xf32>
    %cst_141 = arith.constant dense<0.000000e+00> : vector<16xf32>
    %384 = vector.multi_reduction <add>, %383, %cst_141 [1] : vector<16x32xf32> to vector<16xf32>
    %385 = vector.shape_cast %384 : vector<16xf32> to vector<16x1xf32>
    %cst_142 = arith.constant 3.200000e+01 : f32
    %386 = vector.broadcast %cst_142 : f32 to vector<16x1xf32>
    %387 = arith.divf %385, %386 : vector<16x1xf32>
    %388 = vector.broadcast %387 : vector<16x1xf32> to vector<16x32xf32>
    %389 = arith.subf %383, %388 : vector<16x32xf32>
    %390 = arith.mulf %389, %389 : vector<16x32xf32>
    %cst_143 = arith.constant dense<0.000000e+00> : vector<16xf32>
    %391 = vector.multi_reduction <add>, %390, %cst_143 [1] : vector<16x32xf32> to vector<16xf32>
    %392 = vector.shape_cast %391 : vector<16xf32> to vector<16x1xf32>
    %cst_144 = arith.constant 3.200000e+01 : f32
    %393 = vector.broadcast %cst_144 : f32 to vector<16x1xf32>
    %394 = arith.divf %392, %393 : vector<16x1xf32>
    %395 = vector.broadcast %387 : vector<16x1xf32> to vector<16x32xf32>
    %396 = arith.subf %383, %395 : vector<16x32xf32>
    %cst_145 = arith.constant 9.99999996E-13 : f32
    %397 = vector.broadcast %cst_145 : f32 to vector<16x1xf32>
    %398 = arith.addf %394, %397 : vector<16x1xf32>
    %399 = math.rsqrt %398 : vector<16x1xf32>
    %400 = vector.broadcast %399 : vector<16x1xf32> to vector<16x32xf32>
    %401 = arith.mulf %396, %400 : vector<16x32xf32>
    %402 = vector.broadcast %255 : vector<1x32xf32> to vector<16x32xf32>
    %403 = arith.mulf %401, %402 : vector<16x32xf32>
    %404 = vector.broadcast %257 : vector<1x32xf32> to vector<16x32xf32>
    %405 = arith.addf %403, %404 : vector<16x32xf32>
    %406 = arith.truncf %405 : vector<16x32xf32> to vector<16x32xbf16>
    %cst_146 = arith.constant dense<0.000000e+00> : vector<16x64xf32>
    %407 = tpu.matmul %406, %247, %cst_146 {dimension_numbers = #tpu.dot_dimension_numbers<[1], [0], [0], [1], [0, 0, 1, 1], [], []>} : vector<16x32xbf16>, vector<32x64xbf16>, vector<16x64xf32> -> vector<16x64xf32>
    %408 = vector.broadcast %249 : vector<1x64xf32> to vector<16x64xf32>
    %409 = arith.addf %407, %408 : vector<16x64xf32>
    %cst_147 = arith.constant 5.000000e-01 : f32
    %410 = vector.broadcast %cst_147 : f32 to vector<16x64xf32>
    %411 = arith.mulf %410, %409 : vector<16x64xf32>
    %cst_148 = arith.constant 4.471500e-02 : f32
    %412 = vector.broadcast %cst_148 : f32 to vector<16x64xf32>
    %413 = arith.mulf %412, %409 : vector<16x64xf32>
    %414 = arith.mulf %413, %409 : vector<16x64xf32>
    %415 = arith.mulf %414, %409 : vector<16x64xf32>
    %416 = arith.addf %409, %415 : vector<16x64xf32>
    %cst_149 = arith.constant 0.797884583 : f32
    %417 = vector.broadcast %cst_149 : f32 to vector<16x64xf32>
    %418 = arith.mulf %417, %416 : vector<16x64xf32>
    %419 = math.tanh %418 : vector<16x64xf32>
    %cst_150 = arith.constant 1.000000e+00 : f32
    %420 = vector.broadcast %cst_150 : f32 to vector<16x64xf32>
    %421 = arith.addf %420, %419 : vector<16x64xf32>
    %422 = arith.mulf %411, %421 : vector<16x64xf32>
    %423 = arith.truncf %422 : vector<16x64xf32> to vector<16x64xbf16>
    %cst_151 = arith.constant dense<0.000000e+00> : vector<16x32xf32>
    %424 = tpu.matmul %423, %251, %cst_151 {dimension_numbers = #tpu.dot_dimension_numbers<[1], [0], [0], [1], [0, 0, 1, 1], [], []>} : vector<16x64xbf16>, vector<64x32xbf16>, vector<16x32xf32> -> vector<16x32xf32>
    %425 = vector.broadcast %253 : vector<1x32xf32> to vector<16x32xf32>
    %426 = arith.addf %424, %425 : vector<16x32xf32>
    %427 = arith.addf %405, %426 : vector<16x32xf32>
    %cst_152 = arith.constant dense<0.000000e+00> : vector<16xf32>
    %428 = vector.multi_reduction <add>, %427, %cst_152 [1] : vector<16x32xf32> to vector<16xf32>
    %429 = vector.shape_cast %428 : vector<16xf32> to vector<16x1xf32>
    %cst_153 = arith.constant 3.200000e+01 : f32
    %430 = vector.broadcast %cst_153 : f32 to vector<16x1xf32>
    %431 = arith.divf %429, %430 : vector<16x1xf32>
    %432 = vector.broadcast %431 : vector<16x1xf32> to vector<16x32xf32>
    %433 = arith.subf %427, %432 : vector<16x32xf32>
    %434 = arith.mulf %433, %433 : vector<16x32xf32>
    %cst_154 = arith.constant dense<0.000000e+00> : vector<16xf32>
    %435 = vector.multi_reduction <add>, %434, %cst_154 [1] : vector<16x32xf32> to vector<16xf32>
    %436 = vector.shape_cast %435 : vector<16xf32> to vector<16x1xf32>
    %cst_155 = arith.constant 3.200000e+01 : f32
    %437 = vector.broadcast %cst_155 : f32 to vector<16x1xf32>
    %438 = arith.divf %436, %437 : vector<16x1xf32>
    %439 = vector.broadcast %431 : vector<16x1xf32> to vector<16x32xf32>
    %440 = arith.subf %427, %439 : vector<16x32xf32>
    %cst_156 = arith.constant 9.99999996E-13 : f32
    %441 = vector.broadcast %cst_156 : f32 to vector<16x1xf32>
    %442 = arith.addf %438, %441 : vector<16x1xf32>
    %443 = math.rsqrt %442 : vector<16x1xf32>
    %444 = vector.broadcast %443 : vector<16x1xf32> to vector<16x32xf32>
    %445 = arith.mulf %440, %444 : vector<16x32xf32>
    %446 = vector.broadcast %259 : vector<1x32xf32> to vector<16x32xf32>
    %447 = arith.mulf %445, %446 : vector<16x32xf32>
    %448 = vector.broadcast %261 : vector<1x32xf32> to vector<16x32xf32>
    %449 = arith.addf %447, %448 : vector<16x32xf32>
    %450 = vector.shape_cast %449 : vector<16x32xf32> to vector<2x8x32xf32>
    %451 = vector.extract_strided_slice %450 {offsets = [0, 0, 0], sizes = [2, 1, 32], strides = [1, 1, 1]} : vector<2x8x32xf32> to vector<2x1x32xf32>
    %452 = vector.shape_cast %451 : vector<2x1x32xf32> to vector<2x32xf32>
    %c0_157 = arith.constant 0 : index
    %c0_158 = arith.constant 0 : index
    %453 = vector.load %arg16[%c0_157, %c0_158] : memref<32x32xbf16, #tpu.memory_space<vmem>>, vector<32x32xbf16>
    %454 = arith.truncf %452 : vector<2x32xf32> to vector<2x32xbf16>
    %cst_159 = arith.constant dense<0.000000e+00> : vector<2x32xf32>
    %455 = tpu.matmul %454, %453, %cst_159 {dimension_numbers = #tpu.dot_dimension_numbers<[1], [0], [0], [1], [0, 0, 1, 1], [], []>} : vector<2x32xbf16>, vector<32x32xbf16>, vector<2x32xf32> -> vector<2x32xf32>
    %c0_160 = arith.constant 0 : index
    %c0_161 = arith.constant 0 : index
    %456 = vector.load %arg17[%c0_160, %c0_161] : memref<1x32xf32, #tpu.memory_space<vmem>>, vector<1x32xf32>
    %457 = vector.broadcast %456 : vector<1x32xf32> to vector<2x32xf32>
    %458 = arith.addf %455, %457 : vector<2x32xf32>
    %459 = math.tanh %458 : vector<2x32xf32>
    %c0_162 = arith.constant 0 : index
    %c0_163 = arith.constant 0 : index
    %460 = vector.load %arg18[%c0_162, %c0_163] : memref<32x2xbf16, #tpu.memory_space<vmem>>, vector<32x2xbf16>
    %461 = arith.truncf %459 : vector<2x32xf32> to vector<2x32xbf16>
    %cst_164 = arith.constant dense<0.000000e+00> : vector<2x2xf32>
    %462 = tpu.matmul %461, %460, %cst_164 {dimension_numbers = #tpu.dot_dimension_numbers<[1], [0], [0], [1], [0, 0, 1, 1], [], []>} : vector<2x32xbf16>, vector<32x2xbf16>, vector<2x2xf32> -> vector<2x2xf32>
    %c0_165 = arith.constant 0 : index
    %c0_166 = arith.constant 0 : index
    %463 = vector.load %arg19[%c0_165, %c0_166] : memref<1x2xf32, #tpu.memory_space<vmem>>, vector<1x2xf32>
    %464 = vector.broadcast %463 : vector<1x2xf32> to vector<2x2xf32>
    %465 = arith.addf %462, %464 : vector<2x2xf32>
    %c0_167 = arith.constant 0 : index
    %c0_168 = arith.constant 0 : index
    %466 = vector.load %arg20[%c0_167, %c0_168] : memref<2x2xf32, #tpu.memory_space<vmem>>, vector<2x2xf32>
    tpu.vector_store %arg20[%c0_167, %c0_168], %465 {strides = array<i32>} : memref<2x2xf32, #tpu.memory_space<vmem>>, vector<2x2xf32>,
    return
  }
}

</mosaic_0001>

<bundles_post_ra>
// kernel: tpu_custom_call.1
= control target key start
LH: loop header
LB: loop body
LE: loop exit
PB: predicated region body
PF: predicated region fallthrough
CT: control target
= control target key end

     0   :  { %s4854_s0 = inlined_call_operand.hbm [shape: f32[16,32], index: 0, kind: input, shape index: {}]   ;;  %s4855_s1 = inlined_call_operand.vmem [shape: f32[2,1,8], index: 1, kind: input, shape index: {}]   ;;  %s4856_s2 = inlined_call_operand.hbm [shape: f32[1,32], index: 2, kind: input, shape index: {}]   ;;  %s4857_s3 = inlined_call_operand.hbm [shape: f32[1,32], index: 3, kind: input, shape index: {}]   ;;  %s4858_s4 = inlined_call_operand.vmem [shape: bf16[2,32,96], index: 4, kind: input, shape index: {}]   ;;  %s4859_s5 = inlined_call_operand.vmem [shape: f32[2,1,96], index: 5, kind: input, shape index: {}]   ;;  %s4860_s6 = inlined_call_operand.vmem [shape: bf16[2,32,32], index: 6, kind: input, shape index: {}]   ;;  %s4861_s7 = inlined_call_operand.vmem [shape: f32[2,1,32], index: 7, kind: input, shape index: {}]   ;;  %s4862_s8 = inlined_call_operand.hbm [shape: f32[2,1,32], index: 8, kind: input, shape index: {}]   ;;  %s4863_s9 = inlined_call_operand.hbm [shape: f32[2,1,32], index: 9, kind: input, shape index: {}]   ;;  %s4864_s10 = inlined_call_operand.vmem [shape: bf16[2,32,64], index: 10, kind: input, shape index: {}]   ;;  %s4865_s11 = inlined_call_operand.hbm [shape: f32[2,1,64], index: 11, kind: input, shape index: {}]   ;;  %s4866_s12 = inlined_call_operand.vmem [shape: bf16[2,64,32], index: 12, kind: input, shape index: {}]   ;;  %s4867_s13 = inlined_call_operand.vmem [shape: f32[2,1,32], index: 13, kind: input, shape index: {}]   ;;  %s4868_s14 = inlined_call_operand.vmem [shape: f32[2,1,32], index: 14, kind: input, shape index: {}]   ;;  %s4869_s15 = inlined_call_operand.vmem [shape: f32[2,1,32], index: 15, kind: input, shape index: {}]   ;;  %s4870_s16 = inlined_call_operand.hbm [shape: bf16[32,32], index: 16, kind: input, shape index: {}]   ;;  %s4871_s17 = inlined_call_operand.vmem [shape: f32[1,32], index: 17, kind: input, shape index: {}]   ;;  %s4872_s18 = inlined_call_operand.vmem [shape: bf16[32,2], index: 18, kind: input, shape index: {}]   ;;  %s4873_s19 = inlined_call_operand.vmem [shape: f32[1,2], index: 19, kind: input, shape index: {}]   ;;  %s4874_s20 = inlined_call_operand.hbm [shape: f32[2,2], index: 20, kind: output, shape index: {}]  }
   0x1   :  { %4881 = sst [smem:[#allocation20_spill]] %s4854_s0 }
   0x2   :  { %4882 = sst [smem:[#allocation21_spill]] %s4855_s1 }
   0x3   :  { %4883 = sst [smem:[#allocation22_spill]] %s4856_s2 }
   0x4   :  { %4884 = sst [smem:[#allocation23_spill]] %s4857_s3 }
   0x5   :  { %4885 = sst [smem:[#allocation24_spill]] %s4858_s4 }
   0x6   :  { %25 = vsyncpa [#allocation3], 0 }
   0x7   :  { %26 = vsyncpa [#allocation6], 0 }
   0x8   :  { %27 = vsyncpa [#allocation9], 0 }
   0x9   :  { %28 = vsyncpa [#allocation12], 0 }
   0xa   :  { %29 = vsyncpa [#allocation4], 0  ;;  %s4084_s1 = smov [#allocation5]   ;;  %s4085_s23 = smov [#allocation8]  }
   0xb   :  { %s50_s22 = sshll.u32 %s4084_s1, 4  ;;  %s77_s24 = sshll.u32 %s4085_s23, 4  ;;  %s51_s22 = int_to_ptr.vmem [resolvable:$true] %s50_s22  ;;  %s78_s24 = int_to_ptr.vmem [resolvable:$true] %s77_s24 }
   0xc   :  { %s3922_s2 = scalar_lea.vmem %s51_s22, 16  ;;  %s3926_s25 = scalar_lea.vmem %s51_s22, 32 }
   0xd   :  { %p3923_p0 = scmp.ne.s32.totalorder %s51_s22, %s3922_s2  ;;  %p3927_p1 = scmp.lt.s32.totalorder %s51_s22, %s51_s22 }
   0xe   :  { %p3928_p2 = scmp.lt.s32.totalorder %s3926_s25, %s3922_s2 }
  0x10   :  { %p3929_p3 = por %p3928_p2, %p3927_p1 }
  0x12   :  { %p3930_p4 = pnand %p3929_p3, %p3923_p0 }
  0x14   :  { %3933 = shalt.err (!%p3930_p4)
}
  0x15   :  { %s4886_s27 = sld [smem:[#allocation22_spill]]  ;;  %s3942_s28 = scalar_lea.vmem %s78_s24, 32 }
  0x16   :  { %p3943_p5 = scmp.ne.s32.totalorder %s78_s24, %s3942_s28  ;;  %p3947_p6 = scmp.lt.s32.totalorder %s78_s24, %s78_s24 }
  0x17   :  { %p3948_p7 = scmp.lt.s32.totalorder %s3942_s28, %s3942_s28 }
  0x19   :  { %p3949_p8 = por %p3948_p7, %p3947_p6 }
  0x1b   :  { %53 = dma.hbm_to_vmem [thread:$0]  %s4886_s27, 16, %s51_s22, [#allocation6]  }
  0x1c   :  { %p3950_p9 = pnand %p3949_p8, %p3943_p5 }
  0x1e   :  { %3953 = shalt.err (!%p3950_p9)
}
  0x1f   :  { %s4086_s4 = smov 16   ;;  %s4087_s29 = smov 1  }
  0x20   :  { %83 = dma.hbm_to_vmem [thread:$0]  %s4862_s8, 32, %s78_s24, [#allocation9], %s4086_s4, %s4086_s4, %s4087_s29  }
  0x21   :  { %s4088_s21 = smov [#allocation11]   ;;  %s4089_s23 = smov [#allocation2]  }
  0x22   :  { %s103_s1 = sshll.u32 %s4088_s21, 4  ;;  %s35_s22 = sshll.u32 %s4089_s23, 4  ;;  %s104_s1 = int_to_ptr.vmem [resolvable:$true] %s103_s1  ;;  %s36_s22 = int_to_ptr.vmem [resolvable:$true] %s35_s22 }
  0x23   :  { %s3962_s2 = scalar_lea.vmem %s104_s1, 32  ;;  %p3967_p11 = scmp.lt.s32.totalorder %s104_s1, %s104_s1 }
  0x24   :  { %p3963_p10 = scmp.ne.s32.totalorder %s104_s1, %s3962_s2  ;;  %p3968_p12 = scmp.lt.s32.totalorder %s3962_s2, %s3962_s2 }
  0x26   :  { %p3969_p13 = por %p3968_p12, %p3967_p11 }
  0x28   :  { %p3970_p0 = pnand %p3969_p13, %p3963_p10 }
  0x2a   :  { %3973 = shalt.err (!%p3970_p0)
}
  0x2b   :  { %109 = dma.hbm_to_vmem [thread:$0]  %s4865_s11, 32, %s104_s1, [#allocation12], %s4086_s4, %s4086_s4, %s4087_s29  }
  0x2c   :  { %s3982_s8 = scalar_lea.vmem %s36_s22, 256  ;;  %p3987_p2 = scmp.lt.s32.totalorder %s36_s22, %s36_s22 }
  0x2d   :  { %p3983_p1 = scmp.ne.s32.totalorder %s36_s22, %s3982_s8  ;;  %p3988_p3 = scmp.lt.s32.totalorder %s3982_s8, %s3982_s8 }
  0x2f   :  { %p3989_p4 = por %p3988_p3, %p3987_p2 }
  0x31   :  { %p3990_p5 = pnand %p3989_p4, %p3983_p1 }
  0x33   :  { %3993 = shalt.err (!%p3990_p5)
}
  0x34   :  { %s4090_s24 = smov 128   ;;  %s4091_s26 = smov 8  }
  0x35   :  { %s4887_s30 = sld [smem:[#allocation20_spill]]  ;;  %s4092_s0 = smov [#allocation7]  }
  0x36   :  { %s60_s21 = sshll.u32 %s4092_s0, 4  ;;  %s4093_s23 = smov [#allocation10]   ;;  %s61_s21 = int_to_ptr.vmem [resolvable:$true] %s60_s21 }
  0x37   :  { %s89_s2 = sshll.u32 %s4093_s23, 4  ;;  %s4002_s11 = scalar_lea.vmem %s61_s21, 16  ;;  %s90_s2 = int_to_ptr.vmem [resolvable:$true] %s89_s2 }
  0x38   :  { %p4003_p6 = scmp.ne.s32.totalorder %s61_s21, %s4002_s11  ;;  %s4006_s1 = scalar_lea.vmem %s61_s21, 32 }
  0x39   :  { %p4007_p7 = scmp.lt.s32.totalorder %s61_s21, %s61_s21  ;;  %p4008_p8 = scmp.lt.s32.totalorder %s4006_s1, %s4002_s11 }
  0x3b   :  { %41 = dma.hbm_to_vmem [thread:$0]  %s4887_s30, 256, %s36_s22, [#allocation3], %s4090_s24, %s4090_s24, %s4091_s26  }
  0x3c   :  { %p4009_p9 = por %p4008_p8, %p4007_p7 }
  0x3e   :  { %p4010_p10 = pnand %p4009_p9, %p4003_p6 }
  0x40   :  { %4013 = shalt.err (!%p4010_p10)
}
  0x41   :  { %s4888_s8 = sld [smem:[#allocation23_spill]]  ;;  %s4022_s27 = scalar_lea.vmem %s90_s2, 32 }
  0x42   :  { %p4023_p11 = scmp.ne.s32.totalorder %s90_s2, %s4022_s27  ;;  %p4027_p12 = scmp.lt.s32.totalorder %s90_s2, %s90_s2 }
  0x43   :  { %p4028_p13 = scmp.lt.s32.totalorder %s4022_s27, %s4022_s27 }
  0x45   :  { %p4029_p0 = por %p4028_p13, %p4027_p12 }
  0x47   :  { %63 = dma.hbm_to_vmem [thread:$0]  %s4888_s8, 16, %s61_s21, [#allocation6]  }
  0x48   :  { %p4030_p1 = pnand %p4029_p0, %p4023_p11 }
  0x4a   :  { %4033 = shalt.err (!%p4030_p1)
}
  0x4b   :  { %95 = dma.hbm_to_vmem [thread:$0]  %s4863_s9, 32, %s90_s2, [#allocation9], %s4086_s4, %s4086_s4, %s4087_s29  }
  0x4c   :  { %s4094_s26 = smov [#allocation13]  }
  0x4d   :  { %s123_s28 = sshll.u32 %s4094_s26, 4  ;;  %s124_s28 = int_to_ptr.vmem [resolvable:$true] %s123_s28 }
  0x4e   :  { %s4042_s30 = scalar_lea.vmem %s124_s28, 256  ;;  %p4047_p3 = scmp.lt.s32.totalorder %s124_s28, %s124_s28 }
  0x4f   :  { %p4043_p2 = scmp.ne.s32.totalorder %s124_s28, %s4042_s30  ;;  %p4048_p4 = scmp.lt.s32.totalorder %s4042_s30, %s4042_s30 }
  0x51   :  { %p4049_p5 = por %p4048_p4, %p4047_p3 }
  0x53   :  { %p4050_p6 = pnand %p4049_p5, %p4043_p2 }
  0x55   :  { %4053 = shalt.err (!%p4050_p6)
}
  0x56   :  { %s4095_s0 = smov 64   ;;  %s4096_s21 = smov 4  }
  0x57   :  { %129 = dma.hbm_to_vmem [thread:$0]  %s4870_s16, 256, %s124_s28, [#allocation12], %s4095_s0, %s4095_s0, %s4096_s21  }
  0x58   :  { %4074 = dma.done.wait [#allocation3], 256  }
  0x59   :  { %4075 = vsyncadd [#allocation3], 4294967040 }
  0x5a   :  { %4076 = dma.done.wait [#allocation6], 32  }
  0x5b   :  { %4077 = vsyncadd [#allocation6], 4294967264 }
  0x5c   :  { %4078 = dma.done.wait [#allocation9], 64  }
  0x5d   :  { %4079 = vsyncadd [#allocation9], 4294967232 }
  0x5e   :  { %4080 = dma.done.wait [#allocation12], 288  }
  0x5f   :  { %4081 = vsyncadd [#allocation12], 4294967008  ;;  %vm162_vm0 = vcmask 261120   ;;  %v158_v0 = vld [vmem:[#allocation2] sm:$0xff]  ;;  %v159_v1 = vld [vmem:[#allocation2 + $0x8] sm:$0xff]  ;;  %s4889_s4 = sld [smem:[#allocation24_spill]] }
  0x60   :  { %v163_v2 = vsel %vm162_vm0, %v158_v0, 0.0  ;;  %v166_v3 = vsel %vm162_vm0, %v159_v1, 0.0  ;;  %v4097_v15 = vmov 0.0   ;;  %vm4098_vm1 = vmmov 0   ;;  %v3237_v25 = vld [vmem:[#allocation5] ss:$0 sm:$0xff] }
  0x61   :  { %164 = vadd.xlane.f32.xlu0 %v163_v2  ;;  %3460 = vmatprep.subr.bf16.mxu0 %v4097_v15  ;;  %v3238_v29 = vld [vmem:[#allocation7] ss:$0 sm:$0xff]  ;;  %v3239_v34 = vld [vmem:[%s4859_s5] ss:$0 sm:$0xff]  ;;  %s4099_s3 = smov 96   ;;  %vm316_vm2 = vcmask 64512  }
  0x62   :  { %3464 = vmatprep.mubr.msk.bf16.mxu0 %vm4098_vm1, %v4097_v15  ;;  %3468 = vmatprep.subr.bf16.mxu1 %v4097_v15  ;;  %s4890_s22 = sld [smem:[#allocation21_spill]]  ;;  %s4100_s28 = smov 88   ;;  %vm441_vm3 = vcmask 1043456   ;;  %vm1553_vm4 = vcmask 523264   ;;  %vm3091_vm5 = vcmask 1041409   ;;  %vm3217_vm6 = vcmask 9216  }
  0x63   :  { %3470 = vmatprep.mubr.msk.bf16.mxu1 %vm4098_vm1, %v4097_v15  ;;  %s4101_s30 = smov 120   ;;  %s4102_s21 = smov 56  }
  0x64   :  { %s4103_s23 = smov 80   ;;  %s4104_s11 = smov 112  }
  0x65   :  { %167 = vadd.xlane.f32.xlu0 %v166_v3  ;;  %v3798_v14 = vld [vmem:[%s4889_s4 + $0x8] sm:$0xff]   ;;  %v3799_v16 = vld [vmem:[%s4889_s4] sm:$0xff]   ;;  %s4105_s1 = smov 48   ;;  %s4106_s25 = smov 72  }
  0x66   :  { %3461 = vmatpush3.bf16.msra.mxu0 %v3798_v14  ;;  %s4879_s8 = smov 104   ;;  %s4877_s26 = smov 40  }
  0x67   :  { %3462 = vmatprep.subr.bf16.mxu0 %v4097_v15 }
  0x68   :  { %v4300_v47 = vld [vmem:[%s4890_s22] ss:$0 sm:$0xff]  ;;  %v4306_v51 = vld [vmem:[%s4890_s22 + $0x1] ss:$0 sm:$0xff] }
  0x6a   :  { %3463 = vmatpush3.bf16.msra.mxu0 %v3799_v16 }
  0x6b   :  { %3474 = vmatprep.subr.bf16.mxu0 %v4097_v15 }
  0xea   :  { %v165_v4 = vpop.xlane.xlu0 %164 }
  0xeb   :  { %v170_v5 = vmul.f32 0.03125, %v165_v4 }
  0xed   :  { %v172_v6 = vsub.f32 %v158_v0, %v170_v5 }
  0xee   :  { %v168_v7 = vpop.xlane.xlu0 %167 }
  0xef   :  { %v171_v8 = vmul.f32 0.03125, %v168_v7  ;;  %v174_v9 = vmul.f32 %v172_v6, %v172_v6 }
  0xf1   :  { %v173_v10 = vsub.f32 %v159_v1, %v171_v8  ;;  %v176_v11 = vsel %vm162_vm0, %v174_v9, 0.0 }
  0xf2   :  { %177 = vadd.xlane.f32.xlu1 %v176_v11 }
  0xf3   :  { %v175_v12 = vmul.f32 %v173_v10, %v173_v10 }
  0xf5   :  { %v179_v13 = vsel %vm162_vm0, %v175_v12, 0.0 }
  0xf6   :  { %180 = vadd.xlane.f32.xlu1 %v179_v13 }
 0x17b   :  { %v178_v17 = vpop.xlane.xlu1 %177 }
 0x17c   :  { %v182_v18 = vmul.f32 0.03125, %v178_v17 }
 0x17e   :  { %v184_v19 = vadd.f32 1e-12, %v182_v18 }
 0x17f   :  { %v181_v20 = vpop.xlane.xlu1 %180 }
 0x180   :  { %3818 = vrsqrt.f32 %v184_v19  ;;  %v183_v21 = vmul.f32 0.03125, %v181_v20 }
 0x182   :  { %v185_v22 = vadd.f32 1e-12, %v183_v21 }
 0x184   :  { %3820 = vrsqrt.f32 %v185_v22 }
 0x18d   :  { %v3819_v23 = vpop.eup %3818 }
 0x18e   :  { %v188_v24 = vmul.f32 %v3819_v23, %v172_v6 }
 0x190   :  { %v196_v28 = vmul.f32 %v3237_v25, %v188_v24 }
 0x191   :  { %v3821_v26 = vpop.eup %3820 }
 0x192   :  { %v189_v27 = vmul.f32 %v3821_v26, %v173_v10  ;;  %v4265_v31 = vadd.f32 %v3238_v29, %v196_v28 }
 0x194   :  { %v197_v30 = vmul.f32 %v3237_v25, %v189_v27 }
 0x196   :  { %v4267_v32 = vadd.f32 %v3238_v29, %v197_v30 }
 0x198   :  { %v236_v33 = vpack.c.bf16 %v4267_v32, %v4265_v31 }
 0x19a   :  { %3465 = vmatmul.mubr.msk.bf16.vlgmr.msra.gmra.mxu0 %vm162_vm0, %v236_v33 }
 0x19b   :  { %3476 = vmatprep.mubr.msk.bf16.mxu0 %vm4098_vm1, %v4097_v15 }
 0x25a   :  { %v292_v35 = vpop.f32.mrf.mxu0 }
 0x25b   :  { %v293_v36 = vadd.f32 %v3239_v34, %v292_v35 }
 0x25c   :  { %v3466_v37 = vpop.f32.mrf.mxu0 }
 0x25d   :  { %v4277_v38 = vpack.c.bf16 %v293_v36, %v293_v36 }
 0x25e   :  { %v295_v39 = vpop.f32.mrf.mxu0 }
 0x25f   :  { %v296_v40 = vadd.f32 %v3239_v34, %v295_v39  ;;  %314 = vrot.lane.b32.xlu0 %v4277_v38, %s4099_s3 }
 0x260   :  { %v3467_v41 = vpop.f32.mrf.mxu0 }
 0x261   :  { %v4281_v42 = vpack.c.bf16 %v296_v40, %v296_v40 }
 0x263   :  { %364 = vrot.lane.b32.xlu1 %v4281_v42, %s4099_s3 }
 0x2d1   :  { %v315_v43 = vpop.permute.xlu0 %314 }
 0x2d2   :  { %v321_v44 = vsel %vm316_vm2, %v315_v43, 0 }
 0x2d3   :  { %3469 = vmatpush3.bf16.xpose.msra.mxu1 %v321_v44 }
 0x2d4   :  { %3480 = vmatprep.subr.bf16.mxu1 %v4097_v15 }
 0x2d5   :  { %v365_v45 = vpop.permute.xlu1 %364 }
 0x2d6   :  { %v370_v46 = vsel %vm316_vm2, %v365_v45, 0 }
 0x2d7   :  { %3475 = vmatpush3.bf16.xpose.msra.mxu0 %v370_v46 }
 0x2d8   :  { %3486 = vmatprep.subr.bf16.mxu0 %v4097_v15 }
 0x2da   :  { %3471 = vmatmul.mubr.msk.bf16.vlgmr.msra.gmra.mxu1 %vm316_vm2, %v4277_v38 }
 0x2db   :  { %3482 = vmatprep.mubr.msk.bf16.mxu1 %vm4098_vm1, %v4097_v15 }
 0x2de   :  { %3477 = vmatmul.mubr.msk.bf16.vlgmr.msra.gmra.mxu0 %vm316_vm2, %v4281_v42 }
 0x2df   :  { %3488 = vmatprep.mubr.msk.bf16.mxu0 %vm4098_vm1, %v4097_v15 }
 0x39a   :  { %v357_v48 = vpop.f32.mrf.mxu1 }
 0x39b   :  { %v358_v49 = vadd.f32 %v4300_v47, %v357_v48 }
 0x39c   :  { %v3472_v50 = vpop.f32.mrf.mxu1 }
 0x39d   :  { %v412_v52 = vsel %vm316_vm2, %v358_v49, -inf }
 0x39e   :  { %v360_v53 = vpop.f32.mrf.mxu1  ;;  %413 = vmax.xlane.f32.xlu1 %v412_v52  ;;  %v406_v54 = vpop.f32.mrf.mxu0 }
 0x39f   :  { %v407_v55 = vadd.f32 %v4306_v51, %v406_v54 }
 0x3a0   :  { %v3473_v56 = vpop.f32.mrf.mxu1  ;;  %v3478_v57 = vpop.f32.mrf.mxu0 }
 0x3a1   :  { %v415_v58 = vsel %vm316_vm2, %v407_v55, -inf }
 0x3a2   :  { %416 = vmax.xlane.f32.xlu0 %v415_v58  ;;  %v409_v59 = vpop.f32.mrf.mxu0 }
 0x3a4   :  { %v3479_v60 = vpop.f32.mrf.mxu0 }
 0x3af   :  { %485 = vrot.lane.b32.xlu1 %v4281_v42, %s4095_s0 }
 0x3b3   :  { %536 = vrot.lane.b32.xlu1 %v4277_v38, %s4100_s28 }
 0x427   :  { %v414_v61 = vpop.xlane.xlu1 %413 }
 0x428   :  { %v418_v62 = vsub.f32 %v358_v49, %v414_v61 }
 0x42a   :  { %v420_v63 = vmul.f32 1.442695, %v418_v62 }
 0x42b   :  { %v486_v0 = vpop.permute.xlu1 %485  ;;  %v417_v1 = vpop.xlane.xlu0 %416 }
 0x42c   :  { %3822 = vpow2.f32 %v420_v63  ;;  %v491_v2 = vsel %vm441_vm3, %v486_v0, 0  ;;  %v419_v3 = vsub.f32 %v407_v55, %v417_v1 }
 0x42d   :  { %3487 = vmatpush3.bf16.msra.mxu0 %v491_v2 }
 0x42e   :  { %v422_v4 = vmul.f32 1.442695, %v419_v3  ;;  %3498 = vmatprep.subr.bf16.mxu0 %v4097_v15 }
 0x42f   :  { %v537_v9 = vpop.permute.xlu1 %536 }
 0x430   :  { %3824 = vpow2.f32 %v422_v4  ;;  %v542_v19 = vsel %vm316_vm2, %v537_v9, 0  ;;  %v213_v9 = vld [vmem:[%s4860_s6] sm:$0xf] }
 0x439   :  { %v3823_v5 = vpop.eup %3822 }
 0x43a   :  { %v424_v6 = vsel %vm316_vm2, %v3823_v5, 0.0 }
 0x43b   :  { %425 = vadd.xlane.f32.xlu0 %v424_v6 }
 0x43d   :  { %v3825_v7 = vpop.eup %3824 }
 0x43e   :  { %v427_v8 = vsel %vm316_vm2, %v3825_v7, 0.0 }
 0x43f   :  { %428 = vadd.xlane.f32.xlu1 %v427_v8 }
 0x450   :  { %586 = vrot.lane.b32.xlu1 %v4281_v42, %s4100_s28 }
 0x451   :  { %436 = vrot.lane.b32.xlu0 %v4277_v38, %s4095_s0 }
 0x454   :  { %584 = vrot.lane.b32.xlu1 %v4281_v42, %s4101_s30 }
 0x455   :  { %534 = vrot.lane.b32.xlu0 %v4277_v38, %s4101_s30 }
 0x4c4   :  { %v426_v10 = vpop.xlane.xlu0 %425 }
 0x4c5   :  { %3826 = vrcp.f32 %v426_v10 }
 0x4c8   :  { %v429_v11 = vpop.xlane.xlu1 %428  ;;  %v437_v12 = vpop.permute.xlu0 %436 }
 0x4c9   :  { %3828 = vrcp.f32 %v429_v11  ;;  %v443_v13 = vsel %vm441_vm3, %v437_v12, 0  ;;  %v806_v12 = vsel %vm441_vm3, %v213_v9, 0 }
 0x4ca   :  { %3481 = vmatpush3.bf16.msra.mxu1 %v443_v13 }
 0x4cb   :  { %3492 = vmatprep.subr.bf16.mxu1 %v4097_v15 }
 0x4cc   :  { %v587_v21 = vpop.permute.xlu1 %586  ;;  %v535_v24 = vpop.permute.xlu0 %534 }
 0x4cd   :  { %v592_v23 = vsel %vm316_vm2, %v587_v21, 0 }
 0x4d0   :  { %v585_v25 = vpop.permute.xlu1 %584 }
 0x4d2   :  { %v3827_v14 = vpop.eup %3826 }
 0x4d3   :  { %v432_v16 = vmul.f32 %v3827_v14, %v3823_v5 }
 0x4d5   :  { %v434_v17 = vpack.c.bf16 %v432_v16, %v432_v16 }
 0x4d6   :  { %v3829_v18 = vpop.eup %3828 }
 0x4d7   :  { %3483 = vmatmul.mubr.msk.bf16.vlgmr.msra.gmra.mxu1 %vm316_vm2, %v434_v17  ;;  %v433_v20 = vmul.f32 %v3829_v18, %v3825_v7  ;;  %v214_v18 = vld [vmem:[%s4860_s6 + $0x4] sm:$0xf] }
 0x4d8   :  { %3493 = vmatpush3.bf16.xpose.msra.mxu1 %v542_v19  ;;  %3494 = vmatprep.mubr.msk.bf16.mxu1 %vm4098_vm1, %v4097_v15  ;;  %v759_v19 = vsel %vm441_vm3, %v214_v18, 0 }
 0x4d9   :  { %v435_v22 = vpack.c.bf16 %v433_v20, %v433_v20  ;;  %3504 = vmatprep.subr.bf16.mxu1 %v4097_v15 }
 0x4db   :  { %3489 = vmatmul.mubr.msk.bf16.vlgmr.msra.gmra.mxu0 %vm316_vm2, %v435_v22 }
 0x4dc   :  { %3499 = vmatpush3.bf16.xpose.msra.mxu0 %v592_v23  ;;  %3500 = vmatprep.mubr.msk.bf16.mxu0 %vm4098_vm1, %v4097_v15 }
 0x4dd   :  { %3510 = vmatprep.subr.bf16.mxu0 %v4097_v15 }
 0x4df   :  { %3495 = vmatmul.mubr.msk.bf16.vlgmr.msra.gmra.mxu1 %vm316_vm2, %v535_v24 }
 0x4e0   :  { %3506 = vmatprep.mubr.msk.bf16.mxu1 %vm4098_vm1, %v4097_v15 }
 0x4e3   :  { %3501 = vmatmul.mubr.msk.bf16.vlgmr.msra.gmra.mxu0 %vm316_vm2, %v585_v25 }
 0x4e4   :  { %3512 = vmatprep.mubr.msk.bf16.mxu0 %vm4098_vm1, %v4097_v15 }
 0x597   :  { %v4345_v26 = vpop.f32.mrf.mxu1 }
 0x599   :  { %v3484_v27 = vpop.f32.mrf.mxu1 }
 0x59b   :  { %v482_v28 = vpop.f32.mrf.mxu1  ;;  %v4347_v29 = vpop.f32.mrf.mxu0 }
 0x59c   :  { %v533_v30 = vpack.c.bf16 %v4347_v29, %v4345_v26 }
 0x59d   :  { %v3485_v33 = vpop.f32.mrf.mxu1  ;;  %v3490_v34 = vpop.f32.mrf.mxu0 }
 0x59f   :  { %v530_v35 = vpop.f32.mrf.mxu0  ;;  %v578_v36 = vpop.f32.mrf.mxu1 }
 0x5a0   :  { %v579_v37 = vadd.f32 %v4300_v47, %v578_v36 }
 0x5a1   :  { %v3491_v39 = vpop.f32.mrf.mxu0  ;;  %v3496_v40 = vpop.f32.mrf.mxu1 }
 0x5a2   :  { %v634_v41 = vsel %vm316_vm2, %v579_v37, -inf }
 0x5a3   :  { %635 = vmax.xlane.f32.xlu0 %v634_v41  ;;  %v581_v43 = vpop.f32.mrf.mxu1  ;;  %v628_v44 = vpop.f32.mrf.mxu0 }
 0x5a4   :  { %v629_v45 = vadd.f32 %v4306_v51, %v628_v44 }
 0x5a5   :  { %v3497_v46 = vpop.f32.mrf.mxu1  ;;  %v3502_v48 = vpop.f32.mrf.mxu0 }
 0x5a6   :  { %v637_v49 = vsel %vm316_vm2, %v629_v45, -inf }
 0x5a7   :  { %638 = vmax.xlane.f32.xlu1 %v637_v49  ;;  %v631_v50 = vpop.f32.mrf.mxu0 }
 0x5a9   :  { %v3503_v52 = vpop.f32.mrf.mxu0 }
 0x5b8   :  { %706 = vrot.lane.b32.xlu1 %v4281_v42, %s4102_s21 }
 0x5bc   :  { %851 = vrot.lane.b32.xlu1 %v4277_v38, %s4103_s23 }
 0x5c0   :  { %901 = vrot.lane.b32.xlu1 %v4281_v42, %s4103_s23 }
 0x5c4   :  { %899 = vrot.lane.b32.xlu1 %v4281_v42, %s4104_s11 }
 0x62c   :  { %v636_v53 = vpop.xlane.xlu0 %635 }
 0x62d   :  { %v640_v54 = vsub.f32 %v579_v37, %v636_v53 }
 0x62f   :  { %v642_v55 = vmul.f32 1.442695, %v640_v54 }
 0x630   :  { %v639_v56 = vpop.xlane.xlu1 %638 }
 0x631   :  { %3830 = vpow2.f32 %v642_v55  ;;  %v641_v57 = vsub.f32 %v629_v45, %v639_v56 }
 0x633   :  { %v644_v58 = vmul.f32 1.442695, %v641_v57 }
 0x634   :  { %v707_v59 = vpop.permute.xlu1 %706 }
 0x635   :  { %3832 = vpow2.f32 %v644_v58  ;;  %v712_v60 = vsel %vm441_vm3, %v707_v59, 0 }
 0x636   :  { %3511 = vmatpush3.bf16.msra.mxu0 %v712_v60 }
 0x637   :  { %3522 = vmatprep.subr.bf16.mxu0 %v4097_v15 }
 0x638   :  { %v852_v13 = vpop.permute.xlu1 %851 }
 0x639   :  { %v857_v27 = vsel %vm316_vm2, %v852_v13, 0 }
 0x63c   :  { %v902_v14 = vpop.permute.xlu1 %901 }
 0x63d   :  { %v907_v16 = vsel %vm316_vm2, %v902_v14, 0 }
 0x63e   :  { %v3831_v61 = vpop.eup %3830 }
 0x63f   :  { %v646_v62 = vsel %vm316_vm2, %v3831_v61, 0.0 }
 0x640   :  { %647 = vadd.xlane.f32.xlu0 %v646_v62  ;;  %v900_v17 = vpop.permute.xlu1 %899 }
 0x642   :  { %v3833_v63 = vpop.eup %3832 }
 0x643   :  { %v649_v0 = vsel %vm316_vm2, %v3833_v63, 0.0 }
 0x644   :  { %650 = vadd.xlane.f32.xlu0 %v649_v0 }
 0x65a   :  { %658 = vrot.lane.b32.xlu0 %v4277_v38, %s4102_s21 }
 0x65e   :  { %849 = vrot.lane.b32.xlu0 %v4277_v38, %s4104_s11 }
 0x6c9   :  { %v648_v1 = vpop.xlane.xlu0 %647 }
 0x6ca   :  { %3834 = vrcp.f32 %v648_v1 }
 0x6cd   :  { %v651_v2 = vpop.xlane.xlu0 %650 }
 0x6ce   :  { %3836 = vrcp.f32 %v651_v2 }
 0x6d1   :  { %v659_v3 = vpop.permute.xlu0 %658 }
 0x6d2   :  { %v664_v4 = vsel %vm441_vm3, %v659_v3, 0 }
 0x6d3   :  { %3505 = vmatpush3.bf16.msra.mxu1 %v664_v4 }
 0x6d4   :  { %3516 = vmatprep.subr.bf16.mxu1 %v4097_v15 }
 0x6d5   :  { %v850_v33 = vpop.permute.xlu0 %849 }
 0x6d7   :  { %v3835_v5 = vpop.eup %3834 }
 0x6d8   :  { %v654_v6 = vmul.f32 %v3835_v5, %v3831_v61 }
 0x6da   :  { %v656_v7 = vpack.c.bf16 %v654_v6, %v654_v6 }
 0x6db   :  { %v3837_v8 = vpop.eup %3836 }
 0x6dc   :  { %3507 = vmatmul.mubr.msk.bf16.vlgmr.msra.gmra.mxu1 %vm316_vm2, %v656_v7  ;;  %v655_v10 = vmul.f32 %v3837_v8, %v3833_v63 }
 0x6dd   :  { %3518 = vmatprep.mubr.msk.bf16.mxu1 %vm4098_vm1, %v4097_v15  ;;  %3517 = vmatpush3.bf16.msra.mxu1 %v759_v19 }
 0x6de   :  { %v657_v11 = vpack.c.bf16 %v655_v10, %v655_v10  ;;  %3528 = vmatprep.subr.bf16.mxu1 %v4097_v15 }
 0x6e0   :  { %3513 = vmatmul.mubr.msk.bf16.vlgmr.msra.gmra.mxu0 %vm316_vm2, %v657_v11 }
 0x6e1   :  { %3523 = vmatpush3.bf16.msra.mxu0 %v806_v12  ;;  %3524 = vmatprep.mubr.msk.bf16.mxu0 %vm4098_vm1, %v4097_v15 }
 0x6e2   :  { %3534 = vmatprep.subr.bf16.mxu0 %v4097_v15 }
 0x6e8   :  { %3525 = vmatmul.mubr.msk.bf16.vlgmr.msra.gmra.mxu0 %vm316_vm2, %v533_v30 }
 0x6e9   :  { %3535 = vmatpush3.bf16.xpose.msra.mxu0 %v907_v16  ;;  %3536 = vmatprep.mubr.msk.bf16.mxu0 %vm4098_vm1, %v4097_v15 }
 0x6ea   :  { %3546 = vmatprep.subr.bf16.mxu0 %v4097_v15 }
 0x6f0   :  { %3537 = vmatmul.mubr.msk.bf16.vlgmr.msra.gmra.mxu0 %vm316_vm2, %v900_v17 }
 0x6f1   :  { %3548 = vmatprep.mubr.msk.bf16.mxu0 %vm4098_vm1, %v4097_v15 }
 0x79c   :  { %v700_v20 = vpop.f32.mrf.mxu1 }
 0x79e   :  { %v3508_v21 = vpop.f32.mrf.mxu1 }
 0x7a0   :  { %v703_v22 = vpop.f32.mrf.mxu1  ;;  %v748_v23 = vpop.f32.mrf.mxu0 }
 0x7a1   :  { %v754_v24 = vpack.c.bf16 %v748_v23, %v700_v20  ;;  %v215_v23 = vld [vmem:[%s4860_s6 + $0x8] sm:$0xf] }
 0x7a2   :  { %v3509_v25 = vpop.f32.mrf.mxu1  ;;  %v3514_v26 = vpop.f32.mrf.mxu0 }
 0x7a3   :  { %3519 = vmatmul.mubr.msk.bf16.vlgmr.msra.gmra.mxu1 %vm316_vm2, %v754_v24  ;;  %v1074_v24 = vsel %vm441_vm3, %v215_v23, 0 }
 0x7a4   :  { %3529 = vmatpush3.bf16.xpose.msra.mxu1 %v857_v27  ;;  %v751_v28 = vpop.f32.mrf.mxu0  ;;  %3530 = vmatprep.mubr.msk.bf16.mxu1 %vm4098_vm1, %v4097_v15 }
 0x7a5   :  { %3540 = vmatprep.subr.bf16.mxu1 %v4097_v15 }
 0x7a6   :  { %v3515_v29 = vpop.f32.mrf.mxu0 }
 0x7a8   :  { %v4405_v30 = vpop.f32.mrf.mxu0 }
 0x7aa   :  { %v3526_v34 = vpop.f32.mrf.mxu0 }
 0x7ab   :  { %3531 = vmatmul.mubr.msk.bf16.vlgmr.msra.gmra.mxu1 %vm316_vm2, %v850_v33 }
 0x7ac   :  { %v4408_v35 = vpop.f32.mrf.mxu0  ;;  %3542 = vmatprep.mubr.msk.bf16.mxu1 %vm4098_vm1, %v4097_v15 }
 0x7ae   :  { %v3527_v36 = vpop.f32.mrf.mxu0 }
 0x7b0   :  { %v943_v37 = vpop.f32.mrf.mxu0 }
 0x7b1   :  { %v944_v39 = vadd.f32 %v4306_v51, %v943_v37 }
 0x7b2   :  { %v3538_v40 = vpop.f32.mrf.mxu0 }
 0x7b3   :  { %v952_v41 = vsel %vm316_vm2, %v944_v39, -inf }
 0x7b4   :  { %953 = vmax.xlane.f32.xlu1 %v952_v41  ;;  %v946_v43 = vpop.f32.mrf.mxu0 }
 0x7b6   :  { %v3539_v44 = vpop.f32.mrf.mxu0 }
 0x7c5   :  { %1021 = vrot.lane.b32.xlu1 %v4281_v42, %s4105_s1 }
 0x7c9   :  { %1121 = vrot.lane.b32.xlu1 %v4277_v38, %s4106_s25 }
 0x7cd   :  { %1171 = vrot.lane.b32.xlu1 %v4281_v42, %s4106_s25 }
 0x7d1   :  { %1169 = vrot.lane.b32.xlu1 %v4281_v42, %s4879_s8 }
 0x83d   :  { %v954_v45 = vpop.xlane.xlu1 %953 }
 0x83e   :  { %v956_v49 = vsub.f32 %v944_v39, %v954_v45 }
 0x840   :  { %v959_v50 = vmul.f32 1.442695, %v956_v49 }
 0x841   :  { %v1022_v46 = vpop.permute.xlu1 %1021 }
 0x842   :  { %v1027_v48 = vsel %vm441_vm3, %v1022_v46, 0  ;;  %3838 = vpow2.f32 %v959_v50 }
 0x843   :  { %3547 = vmatpush3.bf16.msra.mxu0 %v1027_v48 }
 0x844   :  { %3558 = vmatprep.subr.bf16.mxu0 %v4097_v15 }
 0x845   :  { %v1122_v8 = vpop.permute.xlu1 %1121 }
 0x846   :  { %v1127_v10 = vsel %vm316_vm2, %v1122_v8, 0 }
 0x849   :  { %v1172_v34 = vpop.permute.xlu1 %1171 }
 0x84a   :  { %v1177_v40 = vsel %vm316_vm2, %v1172_v34, 0 }
 0x84d   :  { %v1170_v43 = vpop.permute.xlu1 %1169 }
 0x84f   :  { %v3839_v60 = vpop.eup %3838 }
 0x850   :  { %v964_v63 = vsel %vm316_vm2, %v3839_v60, 0.0 }
 0x863   :  { %v4424_v52 = vpop.f32.mrf.mxu1 }
 0x864   :  { %v843_v50 = vadd.f32 %v4405_v30, %v4424_v52 }
 0x865   :  { %v3520_v53 = vpop.f32.mrf.mxu1 }
 0x867   :  { %v4426_v54 = vpop.f32.mrf.mxu1 }
 0x869   :  { %v3521_v55 = vpop.f32.mrf.mxu1 }
 0x86b   :  { %v893_v56 = vpop.f32.mrf.mxu1 }
 0x86c   :  { %v894_v57 = vadd.f32 %v4300_v47, %v893_v56 }
 0x86d   :  { %v3532_v58 = vpop.f32.mrf.mxu1 }
 0x86e   :  { %v949_v59 = vsel %vm316_vm2, %v894_v57, -inf }
 0x86f   :  { %950 = vmax.xlane.f32.xlu0 %v949_v59  ;;  %v896_v61 = vpop.f32.mrf.mxu1 }
 0x871   :  { %v3533_v62 = vpop.f32.mrf.mxu1 }
 0x873   :  { %965 = vadd.xlane.f32.xlu0 %v964_v63 }
 0x8f8   :  { %v951_v0 = vpop.xlane.xlu0 %950 }
 0x8f9   :  { %v955_v1 = vsub.f32 %v894_v57, %v951_v0  ;;  %v846_v57 = vadd.f32 %v4408_v35, %v4426_v54 }
 0x8fb   :  { %v957_v2 = vmul.f32 1.442695, %v955_v1 }
 0x8fc   :  { %v966_v3 = vpop.xlane.xlu0 %965 }
 0x8fd   :  { %3840 = vpow2.f32 %v957_v2 }
 0x8fe   :  { %3842 = vrcp.f32 %v966_v3 }
 0x90a   :  { %v3841_v4 = vpop.eup %3840 }
 0x90b   :  { %v3843_v5 = vpop.eup %3842  ;;  %v961_v6 = vsel %vm316_vm2, %v3841_v4, 0.0 }
 0x90c   :  { %962 = vadd.xlane.f32.xlu0 %v961_v6  ;;  %v970_v7 = vmul.f32 %v3843_v5, %v3839_v60 }
 0x90e   :  { %v972_v9 = vpack.c.bf16 %v970_v7, %v970_v7 }
 0x910   :  { %3549 = vmatmul.mubr.msk.bf16.vlgmr.msra.gmra.mxu0 %vm316_vm2, %v972_v9 }
 0x911   :  { %3559 = vmatpush3.bf16.xpose.msra.mxu0 %v1127_v10  ;;  %3560 = vmatprep.mubr.msk.bf16.mxu0 %vm4098_vm1, %v4097_v15 }
 0x912   :  { %3570 = vmatprep.subr.bf16.mxu0 %v4097_v15 }
 0x922   :  { %973 = vrot.lane.b32.xlu0 %v4277_v38, %s4105_s1 }
 0x926   :  { %1119 = vrot.lane.b32.xlu0 %v4277_v38, %s4879_s8 }
 0x995   :  { %v963_v11 = vpop.xlane.xlu0 %962 }
 0x996   :  { %3844 = vrcp.f32 %v963_v11 }
 0x999   :  { %v974_v12 = vpop.permute.xlu0 %973 }
 0x99a   :  { %v979_v13 = vsel %vm441_vm3, %v974_v12, 0 }
 0x99b   :  { %3541 = vmatpush3.bf16.msra.mxu1 %v979_v13  ;;  %v216_v13 = vld [vmem:[%s4860_s6 + $0xc] sm:$0xf] }
 0x99c   :  { %3552 = vmatprep.subr.bf16.mxu1 %v4097_v15 }
 0x99d   :  { %v1120_v14 = vpop.permute.xlu0 %1119 }
 0x99e   :  { %3561 = vmatmul.mubr.msk.bf16.vlgmr.msra.gmra.mxu0 %vm316_vm2, %v1120_v14  ;;  %v1344_v14 = vsel %vm441_vm3, %v216_v13, 0 }
 0x99f   :  { %3572 = vmatprep.mubr.msk.bf16.mxu0 %vm4098_vm1, %v4097_v15 }
 0x9a3   :  { %v3845_v16 = vpop.eup %3844 }
 0x9a4   :  { %v969_v17 = vmul.f32 %v3845_v16, %v3841_v4 }
 0x9a6   :  { %v971_v18 = vpack.c.bf16 %v969_v17, %v969_v17 }
 0x9a8   :  { %3543 = vmatmul.mubr.msk.bf16.vlgmr.msra.gmra.mxu1 %vm316_vm2, %v971_v18 }
 0x9a9   :  { %3554 = vmatprep.mubr.msk.bf16.mxu1 %vm4098_vm1, %v4097_v15  ;;  %3553 = vmatpush3.bf16.msra.mxu1 %v1074_v24 }
 0x9aa   :  { %3564 = vmatprep.subr.bf16.mxu1 %v4097_v15 }
 0x9d0   :  { %v1063_v19 = vpop.f32.mrf.mxu0 }
 0x9d2   :  { %v3550_v20 = vpop.f32.mrf.mxu0 }
 0x9d4   :  { %v1066_v21 = vpop.f32.mrf.mxu0 }
 0x9d6   :  { %v3551_v22 = vpop.f32.mrf.mxu0 }
 0xa5e   :  { %v1163_v25 = vpop.f32.mrf.mxu0 }
 0xa5f   :  { %v1164_v26 = vadd.f32 %v4300_v47, %v1163_v25  ;;  %v3265_v25 = vld [vmem:[%s4861_s7] ss:$0 sm:$0xff] }
 0xa60   :  { %v3562_v27 = vpop.f32.mrf.mxu0 }
 0xa61   :  { %v1219_v28 = vsel %vm316_vm2, %v1164_v26, -inf }
 0xa62   :  { %1220 = vmax.xlane.f32.xlu0 %v1219_v28  ;;  %v1166_v29 = vpop.f32.mrf.mxu0 }
 0xa64   :  { %v3563_v33 = vpop.f32.mrf.mxu0 }
 0xa68   :  { %v1015_v36 = vpop.f32.mrf.mxu1 }
 0xa69   :  { %v1069_v37 = vpack.c.bf16 %v1063_v19, %v1015_v36 }
 0xa6a   :  { %v3544_v39 = vpop.f32.mrf.mxu1 }
 0xa6b   :  { %3555 = vmatmul.mubr.msk.bf16.vlgmr.msra.gmra.mxu1 %vm316_vm2, %v1069_v37 }
 0xa6c   :  { %3565 = vmatpush3.bf16.xpose.msra.mxu1 %v1177_v40  ;;  %v1018_v41 = vpop.f32.mrf.mxu1  ;;  %3566 = vmatprep.mubr.msk.bf16.mxu1 %vm4098_vm1, %v4097_v15 }
 0xa6d   :  { %3576 = vmatprep.subr.bf16.mxu1 %v4097_v15 }
 0xa6e   :  { %v3545_v47 = vpop.f32.mrf.mxu1 }
 0xa73   :  { %3567 = vmatmul.mubr.msk.bf16.vlgmr.msra.gmra.mxu1 %vm316_vm2, %v1170_v43 }
 0xa74   :  { %3578 = vmatprep.mubr.msk.bf16.mxu1 %vm4098_vm1, %v4097_v15 }
 0xaeb   :  { %v1221_v44 = vpop.xlane.xlu0 %1220 }
 0xaec   :  { %v1225_v45 = vsub.f32 %v1164_v26, %v1221_v44 }
 0xaee   :  { %v1227_v46 = vmul.f32 1.442695, %v1225_v45 }
 0xaf0   :  { %3846 = vpow2.f32 %v1227_v46 }
 0xafd   :  { %v3847_v48 = vpop.eup %3846 }
 0xafe   :  { %v1231_v49 = vsel %vm316_vm2, %v3847_v48, 0.0 }
 0xaff   :  { %1232 = vadd.xlane.f32.xlu0 %v1231_v49 }
 0xb2b   :  { %v1110_v53 = vpop.f32.mrf.mxu1 }
 0xb2c   :  { %v1117_v55 = vadd.f32 %v1110_v53, %v843_v50 }
 0xb2d   :  { %v3556_v56 = vpop.f32.mrf.mxu1 }
 0xb2e   :  { %v3801_v56 = vld [vmem:[%s4864_s10] sm:$0xff]  }
 0xb2f   :  { %v1113_v58 = vpop.f32.mrf.mxu1 }
 0xb30   :  { %v1118_v59 = vadd.f32 %v1113_v58, %v846_v57 }
 0xb31   :  { %v3557_v60 = vpop.f32.mrf.mxu1 }
 0xb33   :  { %v1213_v61 = vpop.f32.mrf.mxu1 }
 0xb34   :  { %v1214_v62 = vadd.f32 %v4306_v51, %v1213_v61 }
 0xb35   :  { %v3568_v63 = vpop.f32.mrf.mxu1 }
 0xb36   :  { %v1222_v0 = vsel %vm316_vm2, %v1214_v62, -inf }
 0xb37   :  { %1223 = vmax.xlane.f32.xlu1 %v1222_v0  ;;  %v1216_v1 = vpop.f32.mrf.mxu1 }
 0xb38   :  { %v3266_v1 = vld [vmem:[#allocation8] ss:$0 sm:$0xff] }
 0xb39   :  { %v3569_v2 = vpop.f32.mrf.mxu1 }
 0xb48   :  { %1291 = vrot.lane.b32.xlu1 %v4281_v42, %s4877_s26 }
 0xb88   :  { %v1233_v5 = vpop.xlane.xlu0 %1232 }
 0xbc0   :  { %v1224_v30 = vpop.xlane.xlu1 %1223 }
 0xbc1   :  { %v1226_v52 = vsub.f32 %v1214_v62, %v1224_v30 }
 0xbc3   :  { %v1229_v3 = vmul.f32 1.442695, %v1226_v52 }
 0xbc4   :  { %v1292_v35 = vpop.permute.xlu1 %1291 }
 0xbc5   :  { %3848 = vpow2.f32 %v1229_v3  ;;  %v1297_v54 = vsel %vm441_vm3, %v1292_v35, 0  ;;  %v3267_v3 = vld [vmem:[#allocation10] ss:$0 sm:$0xff] }
 0xbc6   :  { %3577 = vmatpush3.bf16.msra.mxu1 %v1297_v54  ;;  %3850 = vrcp.f32 %v1233_v5  ;;  %v3802_v5 = vld [vmem:[%s4866_s12 + $0x18] sm:$0xff]  }
 0xbc7   :  { %3588 = vmatprep.subr.bf16.mxu1 %v4097_v15 }
 0xbd2   :  { %v3849_v51 = vpop.eup %3848 }
 0xbd3   :  { %v1234_v4 = vsel %vm316_vm2, %v3849_v51, 0.0  ;;  %v3851_v42 = vpop.eup %3850 }
 0xbd4   :  { %1235 = vadd.xlane.f32.xlu0 %v1234_v4  ;;  %v1239_v7 = vmul.f32 %v3851_v42, %v3847_v48  ;;  %v3803_v42 = vld [vmem:[%s4866_s12 + $0x10] sm:$0xff]  }
 0xbd6   :  { %v1241_v10 = vpack.c.bf16 %v1239_v7, %v1239_v7  ;;  %v3805_v7 = vld [vmem:[%s4866_s12] sm:$0xff]  }
 0xbea   :  { %1243 = vrot.lane.b32.xlu0 %v4277_v38, %s4877_s26 }
 0xc5d   :  { %v1236_v6 = vpop.xlane.xlu0 %1235 }
 0xc5e   :  { %3852 = vrcp.f32 %v1236_v6  ;;  %v3804_v6 = vld [vmem:[%s4866_s12 + $0x8] sm:$0xff]  }
 0xc61   :  { %v1244_v8 = vpop.permute.xlu0 %1243 }
 0xc62   :  { %v1249_v9 = vsel %vm441_vm3, %v1244_v8, 0  ;;  %v3268_v8 = vld [vmem:[#allocation11] ss:$0 sm:$0xff] }
 0xc63   :  { %3571 = vmatpush3.bf16.msra.mxu0 %v1249_v9 }
 0xc64   :  { %3582 = vmatprep.subr.bf16.mxu0 %v4097_v15 }
 0xc66   :  { %3573 = vmatmul.mubr.msk.bf16.vlgmr.msra.gmra.mxu0 %vm316_vm2, %v1241_v10 }
 0xc67   :  { %3584 = vmatprep.mubr.msk.bf16.mxu0 %vm4098_vm1, %v4097_v15  ;;  %3583 = vmatpush3.bf16.msra.mxu0 %v1344_v14 }
 0xc68   :  { %3596 = vmatprep.subr.bf16.mxu0 %v4097_v15 }
 0xc6b   :  { %v3853_v11 = vpop.eup %3852 }
 0xc6c   :  { %v1240_v38 = vmul.f32 %v3853_v11, %v3849_v51 }
 0xc6e   :  { %v1242_v12 = vpack.c.bf16 %v1240_v38, %v1240_v38 }
 0xc70   :  { %3579 = vmatmul.mubr.msk.bf16.vlgmr.msra.gmra.mxu1 %vm316_vm2, %v1242_v12 }
 0xc71   :  { %3592 = vmatprep.mubr.msk.bf16.mxu1 %vm4098_vm1, %v4097_v15 }
 0xd26   :  { %v1285_v16 = vpop.f32.mrf.mxu0 }
 0xd28   :  { %v3574_v17 = vpop.f32.mrf.mxu0 }
 0xd2a   :  { %v1288_v18 = vpop.f32.mrf.mxu0 }
 0xd2c   :  { %v3575_v19 = vpop.f32.mrf.mxu0 }
 0xd30   :  { %v1333_v20 = vpop.f32.mrf.mxu1 }
 0xd31   :  { %v1339_v21 = vpack.c.bf16 %v1333_v20, %v1285_v16 }
 0xd32   :  { %v3580_v22 = vpop.f32.mrf.mxu1 }
 0xd33   :  { %3585 = vmatmul.mubr.msk.bf16.vlgmr.msra.gmra.mxu0 %vm316_vm2, %v1339_v21 }
 0xd34   :  { %v1336_v23 = vpop.f32.mrf.mxu1  ;;  %3604 = vmatprep.mubr.msk.bf16.mxu0 %vm4098_vm1, %v4097_v15  ;;  %3597 = vmatpush3.bf16.msra.mxu0 %v3802_v5 }
 0xd35   :  { %3598 = vmatprep.subr.bf16.mxu0 %v4097_v15 }
 0xd36   :  { %v3581_v24 = vpop.f32.mrf.mxu1 }
 0xd38   :  { %3599 = vmatpush3.bf16.msra.mxu0 %v3803_v42 }
 0xd39   :  { %3600 = vmatprep.subr.bf16.mxu0 %v4097_v15 }
 0xd3c   :  { %3601 = vmatpush3.bf16.msra.mxu0 %v3804_v6  ;;  %v3279_v6 = vld [vmem:[%s4869_s15] ss:$0 sm:$0xff] }
 0xd3d   :  { %3602 = vmatprep.subr.bf16.mxu0 %v4097_v15 }
 0xd40   :  { %3603 = vmatpush3.bf16.msra.mxu0 %v3805_v7 }
 0xd41   :  { %3622 = vmatprep.subr.bf16.mxu0 %v4097_v15 }
 0xdf3   :  { %v1380_v26 = vpop.f32.mrf.mxu0 }
 0xdf4   :  { %v1387_v27 = vadd.f32 %v1380_v26, %v1117_v55 }
 0xdf5   :  { %v3586_v28 = vpop.f32.mrf.mxu0 }
 0xdf6   :  { %v1395_v29 = vadd.f32 %v3265_v25, %v1387_v27 }
 0xdf7   :  { %v1383_v33 = vpop.f32.mrf.mxu0 }
 0xdf8   :  { %v1388_v34 = vadd.f32 %v1383_v33, %v1118_v59  ;;  %v1397_v36 = vadd.f32 %v1395_v29, %v4265_v31 }
 0xdf9   :  { %v3587_v37 = vpop.f32.mrf.mxu0 }
 0xdfa   :  { %v1396_v39 = vadd.f32 %v3265_v25, %v1388_v34  ;;  %v1399_v40 = vsel %vm162_vm0, %v1397_v36, 0.0 }
 0xdfb   :  { %1400 = vadd.xlane.f32.xlu1 %v1399_v40 }
 0xdfc   :  { %v1398_v41 = vadd.f32 %v1396_v39, %v4267_v32  ;;  %v3800_v32 = vld [vmem:[%s4864_s10 + $0x8] sm:$0xff]   ;;  %v3272_v39 = vld [vmem:[%s4867_s13] ss:$0 sm:$0xff] }
 0xdfd   :  { %3589 = vmatpush3.bf16.msra.mxu1 %v3800_v32 }
 0xdfe   :  { %v1402_v47 = vsel %vm162_vm0, %v1398_v41, 0.0  ;;  %3590 = vmatprep.subr.bf16.mxu1 %v4097_v15 }
 0xdff   :  { %1403 = vadd.xlane.f32.xlu0 %v1402_v47 }
 0xe01   :  { %3591 = vmatpush3.bf16.msra.mxu1 %v3801_v56 }
 0xe02   :  { %3608 = vmatprep.subr.bf16.mxu1 %v4097_v15 }
 0xe84   :  { %v1401_v43 = vpop.xlane.xlu1 %1400 }
 0xe85   :  { %v1405_v44 = vmul.f32 0.03125, %v1401_v43 }
 0xe87   :  { %v1407_v45 = vsub.f32 %v1397_v36, %v1405_v44 }
 0xe88   :  { %v1404_v46 = vpop.xlane.xlu0 %1403 }
 0xe89   :  { %v1406_v48 = vmul.f32 0.03125, %v1404_v46  ;;  %v1409_v49 = vmul.f32 %v1407_v45, %v1407_v45 }
 0xe8b   :  { %v1408_v50 = vsub.f32 %v1398_v41, %v1406_v48  ;;  %v1411_v53 = vsel %vm162_vm0, %v1409_v49, 0.0 }
 0xe8c   :  { %1412 = vadd.xlane.f32.xlu0 %v1411_v53 }
 0xe8d   :  { %v1410_v31 = vmul.f32 %v1408_v50, %v1408_v50 }
 0xe8f   :  { %v1414_v55 = vsel %vm162_vm0, %v1410_v31, 0.0 }
 0xe90   :  { %1415 = vadd.xlane.f32.xlu1 %v1414_v55 }
 0xf15   :  { %v1413_v57 = vpop.xlane.xlu0 %1412 }
 0xf16   :  { %v1417_v58 = vmul.f32 0.03125, %v1413_v57 }
 0xf18   :  { %v1419_v59 = vadd.f32 1e-12, %v1417_v58 }
 0xf19   :  { %v1416_v60 = vpop.xlane.xlu1 %1415 }
 0xf1a   :  { %3854 = vrsqrt.f32 %v1419_v59  ;;  %v1418_v61 = vmul.f32 0.03125, %v1416_v60 }
 0xf1c   :  { %v1420_v62 = vadd.f32 1e-12, %v1418_v61 }
 0xf1e   :  { %3856 = vrsqrt.f32 %v1420_v62  ;;  %v3806_v62 = vld [vmem:[%s4889_s4 + $0x18] sm:$0xff]  }
 0xf27   :  { %v3855_v63 = vpop.eup %3854 }
 0xf28   :  { %v1423_v0 = vmul.f32 %v3855_v63, %v1407_v45  ;;  %v3807_v63 = vld [vmem:[%s4889_s4 + $0x10] sm:$0xff]  }
 0xf2a   :  { %v1431_v52 = vmul.f32 %v3266_v1, %v1423_v0 }
 0xf2b   :  { %v3857_v2 = vpop.eup %3856 }
 0xf2c   :  { %v1424_v30 = vmul.f32 %v3857_v2, %v1408_v50  ;;  %v1439_v54 = vadd.f32 %v3267_v3, %v1431_v52 }
 0xf2e   :  { %v1432_v35 = vmul.f32 %v3266_v1, %v1424_v30 }
 0xf30   :  { %v1440_v51 = vadd.f32 %v3267_v3, %v1432_v35 }
 0xf32   :  { %v1441_v4 = vpack.c.bf16 %v1440_v51, %v1439_v54 }
 0xf34   :  { %3593 = vmatmul.mubr.msk.bf16.vlgmr.msra.gmra.mxu1 %vm162_vm0, %v1441_v4 }
 0xf35   :  { %3612 = vmatprep.mubr.msk.bf16.mxu1 %vm4098_vm1, %v4097_v15  ;;  %3609 = vmatpush3.bf16.msra.mxu1 %v3806_v62 }
 0xf36   :  { %3610 = vmatprep.subr.bf16.mxu1 %v4097_v15 }
 0xf39   :  { %3611 = vmatpush3.bf16.msra.mxu1 %v3807_v63 }
 0xf3a   :  { %3616 = vmatprep.subr.bf16.mxu1 %v4097_v15 }
 0xff4   :  { %v1497_v9 = vpop.f32.mrf.mxu1 }
 0xff5   :  { %v1498_v10 = vadd.f32 %v3268_v8, %v1497_v9 }
 0xff6   :  { %v3594_v11 = vpop.f32.mrf.mxu1 }
 0xff7   :  { %v1506_v38 = vmul.f32 0.044715, %v1498_v10  ;;  %v1504_v28 = vmul.f32 0.5, %v1498_v10  ;;  %v3305_v11 = vld [vmem:[%s4859_s5 + $0x1] ss:$0 sm:$0xff] }
 0xff8   :  { %v1500_v12 = vpop.f32.mrf.mxu1 }
 0xff9   :  { %v1508_v13 = vmul.f32 %v1506_v38, %v1498_v10  ;;  %v1501_v14 = vadd.f32 %v3268_v8, %v1500_v12 }
 0xffa   :  { %v3595_v16 = vpop.f32.mrf.mxu1 }
 0xffb   :  { %v1510_v17 = vmul.f32 %v1508_v13, %v1498_v10  ;;  %v1507_v18 = vmul.f32 0.044715, %v1501_v14  ;;  %v1505_v29 = vmul.f32 0.5, %v1501_v14 }
 0xffd   :  { %v1512_v19 = vadd.f32 %v1510_v17, %v1498_v10  ;;  %v1509_v20 = vmul.f32 %v1507_v18, %v1501_v14 }
 0xfff   :  { %v1514_v21 = vmul.f32 0.7978846, %v1512_v19  ;;  %v1511_v22 = vmul.f32 %v1509_v20, %v1501_v14 }
0x1001   :  { %3858 = vtanh.f32 %v1514_v21  ;;  %v1513_v23 = vadd.f32 %v1511_v22, %v1501_v14 }
0x1003   :  { %v1515_v24 = vmul.f32 0.7978846, %v1513_v23 }
0x1005   :  { %3860 = vtanh.f32 %v1515_v24 }
0x100e   :  { %v3859_v25 = vpop.eup %3858 }
0x100f   :  { %v1518_v26 = vadd.f32 1.0, %v3859_v25  ;;  %v4589_v25 = vld [vmem:[%s4890_s22] ss:$0 sm:$0xff] }
0x1011   :  { %v1520_v34 = vmul.f32 %v1518_v26, %v1504_v28 }
0x1012   :  { %v3861_v27 = vpop.eup %3860 }
0x1013   :  { %v1519_v33 = vadd.f32 1.0, %v3861_v27 }
0x1015   :  { %v1521_v36 = vmul.f32 %v1519_v33, %v1505_v29 }
0x1017   :  { %v1522_v37 = vpack.c.bf16 %v1521_v36, %v1520_v34  ;;  %v4596_v34 = vld [vmem:[%s4890_s22 + $0x1] ss:$0 sm:$0xff] }
0x1019   :  { %3605 = vmatmul.mubr.msk.bf16.vlgmr.msra.gmra.mxu0 %vm1553_vm4, %v1522_v37 }
0x101a   :  { %3624 = vmatprep.mubr.msk.bf16.mxu0 %vm4098_vm1, %v4097_v15 }
0x10d9   :  { %v1591_v40 = vpop.f32.mrf.mxu0 }
0x10da   :  { %v1592_v41 = vadd.f32 %v3272_v39, %v1591_v40 }
0x10db   :  { %v3606_v47 = vpop.f32.mrf.mxu0 }
0x10dc   :  { %v1598_v43 = vadd.f32 %v1592_v41, %v1439_v54 }
0x10dd   :  { %v1594_v44 = vpop.f32.mrf.mxu0 }
0x10de   :  { %v1595_v45 = vadd.f32 %v3272_v39, %v1594_v44  ;;  %v1600_v46 = vsel %vm162_vm0, %v1598_v43, 0.0 }
0x10df   :  { %1601 = vadd.xlane.f32.xlu0 %v1600_v46  ;;  %v3607_v48 = vpop.f32.mrf.mxu0 }
0x10e0   :  { %v1599_v49 = vadd.f32 %v1595_v45, %v1440_v51  ;;  %v3278_v51 = vld [vmem:[%s4868_s14] ss:$0 sm:$0xff] }
0x10e2   :  { %v1603_v50 = vsel %vm162_vm0, %v1599_v49, 0.0 }
0x10e3   :  { %1604 = vadd.xlane.f32.xlu1 %v1603_v50 }
0x1168   :  { %v1602_v53 = vpop.xlane.xlu0 %1601 }
0x1169   :  { %v1606_v31 = vmul.f32 0.03125, %v1602_v53 }
0x116b   :  { %v1608_v55 = vsub.f32 %v1598_v43, %v1606_v31 }
0x116c   :  { %v1605_v32 = vpop.xlane.xlu1 %1604 }
0x116d   :  { %v1607_v56 = vmul.f32 0.03125, %v1605_v32  ;;  %v1610_v57 = vmul.f32 %v1608_v55, %v1608_v55 }
0x116f   :  { %v1609_v58 = vsub.f32 %v1599_v49, %v1607_v56  ;;  %v1612_v59 = vsel %vm162_vm0, %v1610_v57, 0.0 }
0x1170   :  { %1613 = vadd.xlane.f32.xlu0 %v1612_v59 }
0x1171   :  { %v1611_v60 = vmul.f32 %v1609_v58, %v1609_v58 }
0x1173   :  { %v1615_v61 = vsel %vm162_vm0, %v1611_v60, 0.0 }
0x1174   :  { %1616 = vadd.xlane.f32.xlu1 %v1615_v61 }
0x11f9   :  { %v1614_v0 = vpop.xlane.xlu0 %1613 }
0x11fa   :  { %v1618_v1 = vmul.f32 0.03125, %v1614_v0 }
0x11fc   :  { %v1620_v2 = vadd.f32 1e-12, %v1618_v1 }
0x11fd   :  { %v1617_v30 = vpop.xlane.xlu1 %1616 }
0x11fe   :  { %3862 = vrsqrt.f32 %v1620_v2  ;;  %v1619_v52 = vmul.f32 0.03125, %v1617_v30 }
0x1200   :  { %v1621_v3 = vadd.f32 1e-12, %v1619_v52 }
0x1202   :  { %3864 = vrsqrt.f32 %v1621_v3 }
0x120b   :  { %v3863_v35 = vpop.eup %3862 }
0x120c   :  { %v1624_v54 = vmul.f32 %v3863_v35, %v1608_v55 }
0x120e   :  { %v1632_v42 = vmul.f32 %v3278_v51, %v1624_v54 }
0x120f   :  { %v3865_v4 = vpop.eup %3864 }
0x1210   :  { %v1625_v5 = vmul.f32 %v3865_v4, %v1609_v58  ;;  %v4554_v8 = vadd.f32 %v3279_v6, %v1632_v42 }
0x1212   :  { %v1633_v7 = vmul.f32 %v3278_v51, %v1625_v5 }
0x1214   :  { %v4556_v9 = vadd.f32 %v3279_v6, %v1633_v7 }
0x1216   :  { %v1682_v10 = vpack.c.bf16 %v4556_v9, %v4554_v8 }
0x1218   :  { %3613 = vmatmul.mubr.msk.bf16.vlgmr.msra.gmra.mxu1 %vm162_vm0, %v1682_v10 }
0x1219   :  { %3618 = vmatprep.mubr.msk.bf16.mxu1 %vm4098_vm1, %v4097_v15 }
0x12d8   :  { %v1738_v38 = vpop.f32.mrf.mxu1 }
0x12d9   :  { %v1739_v12 = vadd.f32 %v3305_v11, %v1738_v38 }
0x12da   :  { %v3614_v13 = vpop.f32.mrf.mxu1 }
0x12db   :  { %v4566_v14 = vpack.c.bf16 %v1739_v12, %v1739_v12 }
0x12dc   :  { %v1741_v16 = vpop.f32.mrf.mxu1 }
0x12dd   :  { %v1742_v17 = vadd.f32 %v3305_v11, %v1741_v16  ;;  %1748 = vrot.lane.b32.xlu0 %v4566_v14, %s4099_s3 }
0x12de   :  { %v3615_v18 = vpop.f32.mrf.mxu1 }
0x12df   :  { %v4570_v19 = vpack.c.bf16 %v1742_v17, %v1742_v17 }
0x12e1   :  { %1797 = vrot.lane.b32.xlu1 %v4570_v19, %s4099_s3 }
0x134f   :  { %v1749_v20 = vpop.permute.xlu0 %1748 }
0x1350   :  { %v1754_v21 = vsel %vm316_vm2, %v1749_v20, 0 }
0x1351   :  { %3617 = vmatpush3.bf16.xpose.msra.mxu1 %v1754_v21 }
0x1352   :  { %3628 = vmatprep.subr.bf16.mxu1 %v4097_v15 }
0x1353   :  { %v1798_v22 = vpop.permute.xlu1 %1797 }
0x1354   :  { %v1803_v23 = vsel %vm316_vm2, %v1798_v22, 0 }
0x1355   :  { %3623 = vmatpush3.bf16.xpose.msra.mxu0 %v1803_v23 }
0x1356   :  { %3634 = vmatprep.subr.bf16.mxu0 %v4097_v15 }
0x1358   :  { %3619 = vmatmul.mubr.msk.bf16.vlgmr.msra.gmra.mxu1 %vm316_vm2, %v4566_v14 }
0x1359   :  { %3630 = vmatprep.mubr.msk.bf16.mxu1 %vm4098_vm1, %v4097_v15 }
0x135c   :  { %3625 = vmatmul.mubr.msk.bf16.vlgmr.msra.gmra.mxu0 %vm316_vm2, %v4570_v19 }
0x135d   :  { %3636 = vmatprep.mubr.msk.bf16.mxu0 %vm4098_vm1, %v4097_v15 }
0x1418   :  { %v1790_v24 = vpop.f32.mrf.mxu1 }
0x1419   :  { %v1791_v26 = vadd.f32 %v4589_v25, %v1790_v24 }
0x141a   :  { %v3620_v27 = vpop.f32.mrf.mxu1 }
0x141b   :  { %v1845_v28 = vsel %vm316_vm2, %v1791_v26, -inf }
0x141c   :  { %1846 = vmax.xlane.f32.xlu1 %v1845_v28  ;;  %v1793_v29 = vpop.f32.mrf.mxu1  ;;  %v1839_v33 = vpop.f32.mrf.mxu0 }
0x141d   :  { %v1840_v36 = vadd.f32 %v4596_v34, %v1839_v33 }
0x141e   :  { %v3621_v37 = vpop.f32.mrf.mxu1  ;;  %v3626_v39 = vpop.f32.mrf.mxu0 }
0x141f   :  { %v1848_v40 = vsel %vm316_vm2, %v1840_v36, -inf }
0x1420   :  { %1849 = vmax.xlane.f32.xlu0 %v1848_v40  ;;  %v1842_v41 = vpop.f32.mrf.mxu0 }
0x1422   :  { %v3627_v47 = vpop.f32.mrf.mxu0 }
0x142d   :  { %1917 = vrot.lane.b32.xlu1 %v4570_v19, %s4095_s0 }
0x1431   :  { %1968 = vrot.lane.b32.xlu1 %v4566_v14, %s4100_s28 }
0x14a5   :  { %v1847_v43 = vpop.xlane.xlu1 %1846 }
0x14a6   :  { %v1851_v44 = vsub.f32 %v1791_v26, %v1847_v43 }
0x14a8   :  { %v1853_v45 = vmul.f32 1.442695, %v1851_v44 }
0x14a9   :  { %v1918_v46 = vpop.permute.xlu1 %1917  ;;  %v1850_v48 = vpop.xlane.xlu0 %1849 }
0x14aa   :  { %3866 = vpow2.f32 %v1853_v45  ;;  %v1923_v49 = vsel %vm441_vm3, %v1918_v46, 0  ;;  %v1852_v50 = vsub.f32 %v1840_v36, %v1850_v48 }
0x14ab   :  { %3635 = vmatpush3.bf16.msra.mxu0 %v1923_v49 }
0x14ac   :  { %v1855_v53 = vmul.f32 1.442695, %v1852_v50  ;;  %3646 = vmatprep.subr.bf16.mxu0 %v4097_v15 }
0x14ad   :  { %v1969_v57 = vpop.permute.xlu1 %1968 }
0x14ae   :  { %3868 = vpow2.f32 %v1855_v53  ;;  %v1974_v2 = vsel %vm316_vm2, %v1969_v57, 0  ;;  %v3285_v57 = vld [vmem:[%s4860_s6 + $0x10] sm:$0xf] }
0x14b7   :  { %v3867_v31 = vpop.eup %3866 }
0x14b8   :  { %v1857_v55 = vsel %vm316_vm2, %v3867_v31, 0.0 }
0x14b9   :  { %1858 = vadd.xlane.f32.xlu0 %v1857_v55 }
0x14bb   :  { %v3869_v32 = vpop.eup %3868 }
0x14bc   :  { %v1860_v56 = vsel %vm316_vm2, %v3869_v32, 0.0 }
0x14bd   :  { %1861 = vadd.xlane.f32.xlu1 %v1860_v56 }
0x14ce   :  { %2018 = vrot.lane.b32.xlu1 %v4570_v19, %s4100_s28 }
0x14cf   :  { %1869 = vrot.lane.b32.xlu0 %v4566_v14, %s4095_s0 }
0x14d2   :  { %2016 = vrot.lane.b32.xlu1 %v4570_v19, %s4101_s30 }
0x14d3   :  { %1966 = vrot.lane.b32.xlu0 %v4566_v14, %s4101_s30 }
0x1542   :  { %v1859_v58 = vpop.xlane.xlu0 %1858 }
0x1543   :  { %3870 = vrcp.f32 %v1859_v58 }
0x1546   :  { %v1862_v59 = vpop.xlane.xlu1 %1861  ;;  %v1870_v60 = vpop.permute.xlu0 %1869 }
0x1547   :  { %3872 = vrcp.f32 %v1862_v59  ;;  %v1875_v61 = vsel %vm441_vm3, %v1870_v60, 0  ;;  %v2238_v60 = vsel %vm441_vm3, %v3285_v57, 0 }
0x1548   :  { %3629 = vmatpush3.bf16.msra.mxu1 %v1875_v61 }
0x1549   :  { %3640 = vmatprep.subr.bf16.mxu1 %v4097_v15 }
0x154a   :  { %v2019_v52 = vpop.permute.xlu1 %2018  ;;  %v1967_v54 = vpop.permute.xlu0 %1966 }
0x154b   :  { %v2024_v35 = vsel %vm316_vm2, %v2019_v52, 0 }
0x154e   :  { %v2017_v51 = vpop.permute.xlu1 %2016 }
0x1550   :  { %v3871_v62 = vpop.eup %3870 }
0x1551   :  { %v1865_v63 = vmul.f32 %v3871_v62, %v3867_v31 }
0x1553   :  { %v1867_v0 = vpack.c.bf16 %v1865_v63, %v1865_v63 }
0x1554   :  { %v3873_v1 = vpop.eup %3872 }
0x1555   :  { %3631 = vmatmul.mubr.msk.bf16.vlgmr.msra.gmra.mxu1 %vm316_vm2, %v1867_v0  ;;  %v1866_v30 = vmul.f32 %v3873_v1, %v3869_v32  ;;  %v3286_v1 = vld [vmem:[%s4860_s6 + $0x14] sm:$0xf] }
0x1556   :  { %3641 = vmatpush3.bf16.xpose.msra.mxu1 %v1974_v2  ;;  %3642 = vmatprep.mubr.msk.bf16.mxu1 %vm4098_vm1, %v4097_v15  ;;  %v2191_v2 = vsel %vm441_vm3, %v3286_v1, 0 }
0x1557   :  { %v1868_v3 = vpack.c.bf16 %v1866_v30, %v1866_v30  ;;  %3652 = vmatprep.subr.bf16.mxu1 %v4097_v15 }
0x1559   :  { %3637 = vmatmul.mubr.msk.bf16.vlgmr.msra.gmra.mxu0 %vm316_vm2, %v1868_v3 }
0x155a   :  { %3647 = vmatpush3.bf16.xpose.msra.mxu0 %v2024_v35  ;;  %3648 = vmatprep.mubr.msk.bf16.mxu0 %vm4098_vm1, %v4097_v15 }
0x155b   :  { %3658 = vmatprep.subr.bf16.mxu0 %v4097_v15 }
0x155d   :  { %3643 = vmatmul.mubr.msk.bf16.vlgmr.msra.gmra.mxu1 %vm316_vm2, %v1967_v54 }
0x155e   :  { %3654 = vmatprep.mubr.msk.bf16.mxu1 %vm4098_vm1, %v4097_v15 }
0x1561   :  { %3649 = vmatmul.mubr.msk.bf16.vlgmr.msra.gmra.mxu0 %vm316_vm2, %v2017_v51 }
0x1562   :  { %3660 = vmatprep.mubr.msk.bf16.mxu0 %vm4098_vm1, %v4097_v15 }
0x1615   :  { %v4634_v4 = vpop.f32.mrf.mxu1 }
0x1617   :  { %v3632_v5 = vpop.f32.mrf.mxu1 }
0x1619   :  { %v1914_v42 = vpop.f32.mrf.mxu1  ;;  %v4636_v6 = vpop.f32.mrf.mxu0 }
0x161a   :  { %v1965_v7 = vpack.c.bf16 %v4636_v6, %v4634_v4 }
0x161b   :  { %v3633_v10 = vpop.f32.mrf.mxu1  ;;  %v3638_v11 = vpop.f32.mrf.mxu0 }
0x161d   :  { %v1962_v38 = vpop.f32.mrf.mxu0  ;;  %v2010_v12 = vpop.f32.mrf.mxu1 }
0x161e   :  { %v2011_v13 = vadd.f32 %v4589_v25, %v2010_v12 }
0x161f   :  { %v3639_v16 = vpop.f32.mrf.mxu0  ;;  %v3644_v17 = vpop.f32.mrf.mxu1 }
0x1620   :  { %v2066_v18 = vsel %vm316_vm2, %v2011_v13, -inf }
0x1621   :  { %2067 = vmax.xlane.f32.xlu0 %v2066_v18  ;;  %v2013_v20 = vpop.f32.mrf.mxu1  ;;  %v2060_v21 = vpop.f32.mrf.mxu0 }
0x1622   :  { %v2061_v22 = vadd.f32 %v4596_v34, %v2060_v21 }
0x1623   :  { %v3645_v23 = vpop.f32.mrf.mxu1  ;;  %v3650_v24 = vpop.f32.mrf.mxu0 }
0x1624   :  { %v2069_v26 = vsel %vm316_vm2, %v2061_v22, -inf }
0x1625   :  { %2070 = vmax.xlane.f32.xlu1 %v2069_v26  ;;  %v2063_v27 = vpop.f32.mrf.mxu0 }
0x1627   :  { %v3651_v28 = vpop.f32.mrf.mxu0 }
0x1636   :  { %2138 = vrot.lane.b32.xlu1 %v4570_v19, %s4102_s21 }
0x163a   :  { %2283 = vrot.lane.b32.xlu1 %v4566_v14, %s4103_s23 }
0x163e   :  { %2333 = vrot.lane.b32.xlu1 %v4570_v19, %s4103_s23 }
0x1642   :  { %2331 = vrot.lane.b32.xlu1 %v4570_v19, %s4104_s11 }
0x16aa   :  { %v2068_v29 = vpop.xlane.xlu0 %2067 }
0x16ab   :  { %v2072_v33 = vsub.f32 %v2011_v13, %v2068_v29 }
0x16ad   :  { %v2074_v36 = vmul.f32 1.442695, %v2072_v33 }
0x16ae   :  { %v2071_v37 = vpop.xlane.xlu1 %2070 }
0x16af   :  { %3874 = vpow2.f32 %v2074_v36  ;;  %v2073_v39 = vsub.f32 %v2061_v22, %v2071_v37 }
0x16b1   :  { %v2076_v40 = vmul.f32 1.442695, %v2073_v39 }
0x16b2   :  { %v2139_v41 = vpop.permute.xlu1 %2138 }
0x16b3   :  { %3876 = vpow2.f32 %v2076_v40  ;;  %v2144_v47 = vsel %vm441_vm3, %v2139_v41, 0 }
0x16b4   :  { %3659 = vmatpush3.bf16.msra.mxu0 %v2144_v47 }
0x16b5   :  { %3670 = vmatprep.subr.bf16.mxu0 %v4097_v15 }
0x16b6   :  { %v2284_v61 = vpop.permute.xlu1 %2283 }
0x16b7   :  { %v2289_v5 = vsel %vm316_vm2, %v2284_v61, 0 }
0x16ba   :  { %v2334_v62 = vpop.permute.xlu1 %2333 }
0x16bb   :  { %v2339_v63 = vsel %vm316_vm2, %v2334_v62, 0 }
0x16bc   :  { %v3875_v43 = vpop.eup %3874 }
0x16bd   :  { %v2078_v44 = vsel %vm316_vm2, %v3875_v43, 0.0 }
0x16be   :  { %2079 = vadd.xlane.f32.xlu0 %v2078_v44  ;;  %v2332_v0 = vpop.permute.xlu1 %2331 }
0x16c0   :  { %v3877_v45 = vpop.eup %3876 }
0x16c1   :  { %v2081_v46 = vsel %vm316_vm2, %v3877_v45, 0.0 }
0x16c2   :  { %2082 = vadd.xlane.f32.xlu0 %v2081_v46 }
0x16d8   :  { %2090 = vrot.lane.b32.xlu0 %v4566_v14, %s4102_s21  ;;  %s4891_s21 = smov 104  }
0x16dc   :  { %2281 = vrot.lane.b32.xlu0 %v4566_v14, %s4104_s11 }
0x1747   :  { %v2080_v48 = vpop.xlane.xlu0 %2079 }
0x1748   :  { %3878 = vrcp.f32 %v2080_v48 }
0x174b   :  { %v2083_v49 = vpop.xlane.xlu0 %2082 }
0x174c   :  { %3880 = vrcp.f32 %v2083_v49 }
0x174f   :  { %v2091_v50 = vpop.permute.xlu0 %2090 }
0x1750   :  { %v2096_v53 = vsel %vm441_vm3, %v2091_v50, 0 }
0x1751   :  { %3653 = vmatpush3.bf16.msra.mxu1 %v2096_v53 }
0x1752   :  { %3664 = vmatprep.subr.bf16.mxu1 %v4097_v15 }
0x1753   :  { %v2282_v10 = vpop.permute.xlu0 %2281 }
0x1755   :  { %v3879_v31 = vpop.eup %3878 }
0x1756   :  { %v2086_v55 = vmul.f32 %v3879_v31, %v3875_v43 }
0x1758   :  { %v2088_v32 = vpack.c.bf16 %v2086_v55, %v2086_v55 }
0x1759   :  { %v3881_v56 = vpop.eup %3880 }
0x175a   :  { %3655 = vmatmul.mubr.msk.bf16.vlgmr.msra.gmra.mxu1 %vm316_vm2, %v2088_v32  ;;  %v2087_v58 = vmul.f32 %v3881_v56, %v3877_v45 }
0x175b   :  { %3666 = vmatprep.mubr.msk.bf16.mxu1 %vm4098_vm1, %v4097_v15  ;;  %3665 = vmatpush3.bf16.msra.mxu1 %v2191_v2 }
0x175c   :  { %v2089_v59 = vpack.c.bf16 %v2087_v58, %v2087_v58  ;;  %3676 = vmatprep.subr.bf16.mxu1 %v4097_v15 }
0x175e   :  { %3661 = vmatmul.mubr.msk.bf16.vlgmr.msra.gmra.mxu0 %vm316_vm2, %v2089_v59 }
0x175f   :  { %3671 = vmatpush3.bf16.msra.mxu0 %v2238_v60  ;;  %3672 = vmatprep.mubr.msk.bf16.mxu0 %vm4098_vm1, %v4097_v15 }
0x1760   :  { %3682 = vmatprep.subr.bf16.mxu0 %v4097_v15 }
0x1766   :  { %3673 = vmatmul.mubr.msk.bf16.vlgmr.msra.gmra.mxu0 %vm316_vm2, %v1965_v7 }
0x1767   :  { %3683 = vmatpush3.bf16.xpose.msra.mxu0 %v2339_v63  ;;  %3684 = vmatprep.mubr.msk.bf16.mxu0 %vm4098_vm1, %v4097_v15 }
0x1768   :  { %3694 = vmatprep.subr.bf16.mxu0 %v4097_v15 }
0x176e   :  { %3685 = vmatmul.mubr.msk.bf16.vlgmr.msra.gmra.mxu0 %vm316_vm2, %v2332_v0 }
0x176f   :  { %3696 = vmatprep.mubr.msk.bf16.mxu0 %vm4098_vm1, %v4097_v15 }
0x181a   :  { %v2132_v30 = vpop.f32.mrf.mxu1 }
0x181c   :  { %v3656_v52 = vpop.f32.mrf.mxu1 }
0x181e   :  { %v2135_v3 = vpop.f32.mrf.mxu1  ;;  %v2180_v35 = vpop.f32.mrf.mxu0 }
0x181f   :  { %v2186_v54 = vpack.c.bf16 %v2180_v35, %v2132_v30  ;;  %v3287_v35 = vld [vmem:[%s4860_s6 + $0x18] sm:$0xf] }
0x1820   :  { %v3657_v51 = vpop.f32.mrf.mxu1  ;;  %v3662_v4 = vpop.f32.mrf.mxu0 }
0x1821   :  { %3667 = vmatmul.mubr.msk.bf16.vlgmr.msra.gmra.mxu1 %vm316_vm2, %v2186_v54  ;;  %v2506_v54 = vsel %vm441_vm3, %v3287_v35, 0 }
0x1822   :  { %3677 = vmatpush3.bf16.xpose.msra.mxu1 %v2289_v5  ;;  %v2183_v42 = vpop.f32.mrf.mxu0  ;;  %3678 = vmatprep.mubr.msk.bf16.mxu1 %vm4098_vm1, %v4097_v15 }
0x1823   :  { %3688 = vmatprep.subr.bf16.mxu1 %v4097_v15 }
0x1824   :  { %v3663_v6 = vpop.f32.mrf.mxu0 }
0x1826   :  { %v4694_v7 = vpop.f32.mrf.mxu0 }
0x1828   :  { %v3674_v11 = vpop.f32.mrf.mxu0 }
0x1829   :  { %3679 = vmatmul.mubr.msk.bf16.vlgmr.msra.gmra.mxu1 %vm316_vm2, %v2282_v10 }
0x182a   :  { %v4697_v38 = vpop.f32.mrf.mxu0  ;;  %3690 = vmatprep.mubr.msk.bf16.mxu1 %vm4098_vm1, %v4097_v15 }
0x182c   :  { %v3675_v12 = vpop.f32.mrf.mxu0 }
0x182e   :  { %v2375_v13 = vpop.f32.mrf.mxu0 }
0x182f   :  { %v2376_v16 = vadd.f32 %v4596_v34, %v2375_v13 }
0x1830   :  { %v3686_v17 = vpop.f32.mrf.mxu0 }
0x1831   :  { %v2384_v18 = vsel %vm316_vm2, %v2376_v16, -inf }
0x1832   :  { %2385 = vmax.xlane.f32.xlu1 %v2384_v18  ;;  %v2378_v20 = vpop.f32.mrf.mxu0 }
0x1834   :  { %v3687_v21 = vpop.f32.mrf.mxu0 }
0x1843   :  { %2453 = vrot.lane.b32.xlu1 %v4570_v19, %s4105_s1 }
0x1847   :  { %2553 = vrot.lane.b32.xlu1 %v4566_v14, %s4106_s25 }
0x184b   :  { %2603 = vrot.lane.b32.xlu1 %v4570_v19, %s4106_s25 }
0x184f   :  { %2601 = vrot.lane.b32.xlu1 %v4570_v19, %s4891_s21 }
0x18bb   :  { %v2386_v22 = vpop.xlane.xlu1 %2385 }
0x18bc   :  { %v2388_v26 = vsub.f32 %v2376_v16, %v2386_v22 }
0x18be   :  { %v2391_v27 = vmul.f32 1.442695, %v2388_v26 }
0x18bf   :  { %v2454_v23 = vpop.permute.xlu1 %2453 }
0x18c0   :  { %v2459_v24 = vsel %vm441_vm3, %v2454_v23, 0  ;;  %3882 = vpow2.f32 %v2391_v27 }
0x18c1   :  { %3695 = vmatpush3.bf16.msra.mxu0 %v2459_v24 }
0x18c2   :  { %3706 = vmatprep.subr.bf16.mxu0 %v4097_v15 }
0x18c3   :  { %v2554_v56 = vpop.permute.xlu1 %2553 }
0x18c4   :  { %v2559_v58 = vsel %vm316_vm2, %v2554_v56, 0 }
0x18c7   :  { %v2604_v11 = vpop.permute.xlu1 %2603 }
0x18c8   :  { %v2609_v17 = vsel %vm316_vm2, %v2604_v11, 0 }
0x18cb   :  { %v2602_v20 = vpop.permute.xlu1 %2601 }
0x18cd   :  { %v3883_v47 = vpop.eup %3882 }
0x18ce   :  { %v2396_v45 = vsel %vm316_vm2, %v3883_v47, 0.0 }
0x18e1   :  { %v4713_v28 = vpop.f32.mrf.mxu1 }
0x18e2   :  { %v2275_v27 = vadd.f32 %v4694_v7, %v4713_v28 }
0x18e3   :  { %v3668_v29 = vpop.f32.mrf.mxu1 }
0x18e5   :  { %v4715_v33 = vpop.f32.mrf.mxu1 }
0x18e7   :  { %v3669_v36 = vpop.f32.mrf.mxu1 }
0x18e9   :  { %v2325_v37 = vpop.f32.mrf.mxu1 }
0x18ea   :  { %v2326_v39 = vadd.f32 %v4589_v25, %v2325_v37 }
0x18eb   :  { %v3680_v40 = vpop.f32.mrf.mxu1 }
0x18ec   :  { %v2381_v41 = vsel %vm316_vm2, %v2326_v39, -inf }
0x18ed   :  { %2382 = vmax.xlane.f32.xlu0 %v2381_v41  ;;  %v2328_v43 = vpop.f32.mrf.mxu1 }
0x18ef   :  { %v3681_v44 = vpop.f32.mrf.mxu1 }
0x18f1   :  { %2397 = vadd.xlane.f32.xlu0 %v2396_v45 }
0x1976   :  { %v2383_v46 = vpop.xlane.xlu0 %2382 }
0x1977   :  { %v2387_v48 = vsub.f32 %v2326_v39, %v2383_v46  ;;  %v2278_v39 = vadd.f32 %v4697_v38, %v4715_v33 }
0x1979   :  { %v2389_v49 = vmul.f32 1.442695, %v2387_v48 }
0x197a   :  { %v2398_v50 = vpop.xlane.xlu0 %2397 }
0x197b   :  { %3884 = vpow2.f32 %v2389_v49 }
0x197c   :  { %3886 = vrcp.f32 %v2398_v50 }
0x1988   :  { %v3885_v53 = vpop.eup %3884 }
0x1989   :  { %v3887_v31 = vpop.eup %3886  ;;  %v2393_v55 = vsel %vm316_vm2, %v3885_v53, 0.0 }
0x198a   :  { %2394 = vadd.xlane.f32.xlu0 %v2393_v55  ;;  %v2402_v32 = vmul.f32 %v3887_v31, %v3883_v47 }
0x198c   :  { %v2404_v57 = vpack.c.bf16 %v2402_v32, %v2402_v32 }
0x198e   :  { %3697 = vmatmul.mubr.msk.bf16.vlgmr.msra.gmra.mxu0 %vm316_vm2, %v2404_v57 }
0x198f   :  { %3707 = vmatpush3.bf16.xpose.msra.mxu0 %v2559_v58  ;;  %3708 = vmatprep.mubr.msk.bf16.mxu0 %vm4098_vm1, %v4097_v15 }
0x1990   :  { %3718 = vmatprep.subr.bf16.mxu0 %v4097_v15 }
0x19a0   :  { %2405 = vrot.lane.b32.xlu0 %v4566_v14, %s4105_s1  ;;  %s4892_s1 = smov 40  }
0x19a4   :  { %2551 = vrot.lane.b32.xlu0 %v4566_v14, %s4891_s21 }
0x1a13   :  { %v2395_v59 = vpop.xlane.xlu0 %2394 }
0x1a14   :  { %3888 = vrcp.f32 %v2395_v59 }
0x1a17   :  { %v2406_v60 = vpop.permute.xlu0 %2405 }
0x1a18   :  { %v2411_v61 = vsel %vm441_vm3, %v2406_v60, 0 }
0x1a19   :  { %3689 = vmatpush3.bf16.msra.mxu1 %v2411_v61  ;;  %v3288_v61 = vld [vmem:[%s4860_s6 + $0x1c] sm:$0xf] }
0x1a1a   :  { %3700 = vmatprep.subr.bf16.mxu1 %v4097_v15 }
0x1a1b   :  { %v2552_v62 = vpop.permute.xlu0 %2551 }
0x1a1c   :  { %3709 = vmatmul.mubr.msk.bf16.vlgmr.msra.gmra.mxu0 %vm316_vm2, %v2552_v62  ;;  %v2776_v62 = vsel %vm441_vm3, %v3288_v61, 0 }
0x1a1d   :  { %3720 = vmatprep.mubr.msk.bf16.mxu0 %vm4098_vm1, %v4097_v15 }
0x1a21   :  { %v3889_v63 = vpop.eup %3888 }
0x1a22   :  { %v2401_v0 = vmul.f32 %v3889_v63, %v3885_v53 }
0x1a24   :  { %v2403_v1 = vpack.c.bf16 %v2401_v0, %v2401_v0 }
0x1a26   :  { %3691 = vmatmul.mubr.msk.bf16.vlgmr.msra.gmra.mxu1 %vm316_vm2, %v2403_v1 }
0x1a27   :  { %3702 = vmatprep.mubr.msk.bf16.mxu1 %vm4098_vm1, %v4097_v15  ;;  %3701 = vmatpush3.bf16.msra.mxu1 %v2506_v54 }
0x1a28   :  { %3712 = vmatprep.subr.bf16.mxu1 %v4097_v15 }
0x1a4e   :  { %v2495_v2 = vpop.f32.mrf.mxu0 }
0x1a50   :  { %v3698_v30 = vpop.f32.mrf.mxu0 }
0x1a52   :  { %v2498_v52 = vpop.f32.mrf.mxu0 }
0x1a54   :  { %v3699_v3 = vpop.f32.mrf.mxu0 }
0x1adc   :  { %v2595_v51 = vpop.f32.mrf.mxu0 }
0x1add   :  { %v2596_v4 = vadd.f32 %v4589_v25, %v2595_v51  ;;  %v3329_v51 = vld [vmem:[%s4861_s7 + $0x1] ss:$0 sm:$0xff] }
0x1ade   :  { %v3710_v5 = vpop.f32.mrf.mxu0 }
0x1adf   :  { %v2651_v42 = vsel %vm316_vm2, %v2596_v4, -inf }
0x1ae0   :  { %2652 = vmax.xlane.f32.xlu0 %v2651_v42  ;;  %v2598_v6 = vpop.f32.mrf.mxu0 }
0x1ae2   :  { %v3711_v10 = vpop.f32.mrf.mxu0 }
0x1ae6   :  { %v2447_v12 = vpop.f32.mrf.mxu1 }
0x1ae7   :  { %v2501_v13 = vpack.c.bf16 %v2495_v2, %v2447_v12 }
0x1ae8   :  { %v3692_v16 = vpop.f32.mrf.mxu1 }
0x1ae9   :  { %3703 = vmatmul.mubr.msk.bf16.vlgmr.msra.gmra.mxu1 %vm316_vm2, %v2501_v13 }
0x1aea   :  { %3713 = vmatpush3.bf16.xpose.msra.mxu1 %v2609_v17  ;;  %v2450_v18 = vpop.f32.mrf.mxu1  ;;  %3714 = vmatprep.mubr.msk.bf16.mxu1 %vm4098_vm1, %v4097_v15 }
0x1aeb   :  { %3724 = vmatprep.subr.bf16.mxu1 %v4097_v15 }
0x1aec   :  { %v3693_v25 = vpop.f32.mrf.mxu1 }
0x1af1   :  { %3715 = vmatmul.mubr.msk.bf16.vlgmr.msra.gmra.mxu1 %vm316_vm2, %v2602_v20 }
0x1af2   :  { %3726 = vmatprep.mubr.msk.bf16.mxu1 %vm4098_vm1, %v4097_v15 }
0x1b69   :  { %v2653_v21 = vpop.xlane.xlu0 %2652 }
0x1b6a   :  { %v2657_v22 = vsub.f32 %v2596_v4, %v2653_v21 }
0x1b6c   :  { %v2659_v23 = vmul.f32 1.442695, %v2657_v22 }
0x1b6e   :  { %3890 = vpow2.f32 %v2659_v23 }
0x1b7b   :  { %v3891_v24 = vpop.eup %3890 }
0x1b7c   :  { %v2663_v26 = vsel %vm316_vm2, %v3891_v24, 0.0 }
0x1b7d   :  { %2664 = vadd.xlane.f32.xlu0 %v2663_v26 }
0x1ba9   :  { %v2542_v29 = vpop.f32.mrf.mxu1 }
0x1baa   :  { %v2549_v36 = vadd.f32 %v2542_v29, %v2275_v27 }
0x1bab   :  { %v3704_v37 = vpop.f32.mrf.mxu1 }
0x1bac   :  { %v3809_v37 = vld [vmem:[%s4864_s10 + $0x10] sm:$0xff]  }
0x1bad   :  { %v2545_v40 = vpop.f32.mrf.mxu1 }
0x1bae   :  { %v2550_v41 = vadd.f32 %v2545_v40, %v2278_v39 }
0x1baf   :  { %v3705_v47 = vpop.f32.mrf.mxu1 }
0x1bb1   :  { %v2645_v43 = vpop.f32.mrf.mxu1 }
0x1bb2   :  { %v2646_v44 = vadd.f32 %v4596_v34, %v2645_v43 }
0x1bb3   :  { %v3716_v45 = vpop.f32.mrf.mxu1 }
0x1bb4   :  { %v2654_v46 = vsel %vm316_vm2, %v2646_v44, -inf }
0x1bb5   :  { %2655 = vmax.xlane.f32.xlu1 %v2654_v46  ;;  %v2648_v48 = vpop.f32.mrf.mxu1 }
0x1bb6   :  { %v3330_v48 = vld [vmem:[#allocation8 + $0x1] ss:$0 sm:$0xff] }
0x1bb7   :  { %v3717_v49 = vpop.f32.mrf.mxu1 }
0x1bc6   :  { %2723 = vrot.lane.b32.xlu1 %v4570_v19, %s4892_s1 }
0x1c06   :  { %v2665_v31 = vpop.xlane.xlu0 %2664 }
0x1c3e   :  { %v2656_v7 = vpop.xlane.xlu1 %2655 }
0x1c3f   :  { %v2658_v28 = vsub.f32 %v2646_v44, %v2656_v7 }
0x1c41   :  { %v2661_v50 = vmul.f32 1.442695, %v2658_v28 }
0x1c42   :  { %v2724_v53 = vpop.permute.xlu1 %2723 }
0x1c43   :  { %3892 = vpow2.f32 %v2661_v50  ;;  %v2729_v38 = vsel %vm441_vm3, %v2724_v53, 0  ;;  %v3331_v50 = vld [vmem:[#allocation10 + $0x1] ss:$0 sm:$0xff] }
0x1c44   :  { %3725 = vmatpush3.bf16.msra.mxu1 %v2729_v38  ;;  %3894 = vrcp.f32 %v2665_v31  ;;  %v3810_v31 = vld [vmem:[%s4866_s12 + $0x38] sm:$0xff]  }
0x1c45   :  { %3736 = vmatprep.subr.bf16.mxu1 %v4097_v15 }
0x1c50   :  { %v3893_v34 = vpop.eup %3892 }
0x1c51   :  { %v2666_v33 = vsel %vm316_vm2, %v3893_v34, 0.0  ;;  %v3895_v19 = vpop.eup %3894 }
0x1c52   :  { %2667 = vadd.xlane.f32.xlu0 %v2666_v33  ;;  %v2671_v32 = vmul.f32 %v3895_v19, %v3891_v24  ;;  %v3811_v19 = vld [vmem:[%s4866_s12 + $0x30] sm:$0xff]  }
0x1c54   :  { %v2673_v58 = vpack.c.bf16 %v2671_v32, %v2671_v32  ;;  %v3813_v32 = vld [vmem:[%s4866_s12 + $0x20] sm:$0xff]  }
0x1c68   :  { %2675 = vrot.lane.b32.xlu0 %v4566_v14, %s4892_s1 }
0x1cdb   :  { %v2668_v55 = vpop.xlane.xlu0 %2667 }
0x1cdc   :  { %3896 = vrcp.f32 %v2668_v55  ;;  %v3812_v55 = vld [vmem:[%s4866_s12 + $0x28] sm:$0xff]  }
0x1cdf   :  { %v2676_v56 = vpop.permute.xlu0 %2675 }
0x1ce0   :  { %v2681_v57 = vsel %vm441_vm3, %v2676_v56, 0  ;;  %v3332_v56 = vld [vmem:[#allocation11 + $0x1] ss:$0 sm:$0xff] }
0x1ce1   :  { %3719 = vmatpush3.bf16.msra.mxu0 %v2681_v57 }
0x1ce2   :  { %3730 = vmatprep.subr.bf16.mxu0 %v4097_v15 }
0x1ce4   :  { %3721 = vmatmul.mubr.msk.bf16.vlgmr.msra.gmra.mxu0 %vm316_vm2, %v2673_v58 }
0x1ce5   :  { %3732 = vmatprep.mubr.msk.bf16.mxu0 %vm4098_vm1, %v4097_v15  ;;  %3731 = vmatpush3.bf16.msra.mxu0 %v2776_v62 }
0x1ce6   :  { %3744 = vmatprep.subr.bf16.mxu0 %v4097_v15 }
0x1ce9   :  { %v3897_v59 = vpop.eup %3896 }
0x1cea   :  { %v2672_v14 = vmul.f32 %v3897_v59, %v3893_v34 }
0x1cec   :  { %v2674_v60 = vpack.c.bf16 %v2672_v14, %v2672_v14 }
0x1cee   :  { %3727 = vmatmul.mubr.msk.bf16.vlgmr.msra.gmra.mxu1 %vm316_vm2, %v2674_v60 }
0x1cef   :  { %3740 = vmatprep.mubr.msk.bf16.mxu1 %vm4098_vm1, %v4097_v15 }
0x1da4   :  { %v2717_v63 = vpop.f32.mrf.mxu0 }
0x1da6   :  { %v3722_v0 = vpop.f32.mrf.mxu0 }
0x1da8   :  { %v2720_v1 = vpop.f32.mrf.mxu0 }
0x1daa   :  { %v3723_v2 = vpop.f32.mrf.mxu0 }
0x1dae   :  { %v2765_v30 = vpop.f32.mrf.mxu1 }
0x1daf   :  { %v2771_v52 = vpack.c.bf16 %v2765_v30, %v2717_v63 }
0x1db0   :  { %v3728_v3 = vpop.f32.mrf.mxu1 }
0x1db1   :  { %3733 = vmatmul.mubr.msk.bf16.vlgmr.msra.gmra.mxu0 %vm316_vm2, %v2771_v52 }
0x1db2   :  { %v2768_v35 = vpop.f32.mrf.mxu1  ;;  %3752 = vmatprep.mubr.msk.bf16.mxu0 %vm4098_vm1, %v4097_v15  ;;  %3745 = vmatpush3.bf16.msra.mxu0 %v3810_v31 }
0x1db3   :  { %3746 = vmatprep.subr.bf16.mxu0 %v4097_v15 }
0x1db4   :  { %v3729_v54 = vpop.f32.mrf.mxu1 }
0x1db6   :  { %3747 = vmatpush3.bf16.msra.mxu0 %v3811_v19  ;;  %v3343_v19 = vld [vmem:[%s4869_s15 + $0x1] ss:$0 sm:$0xff] }
0x1db7   :  { %3748 = vmatprep.subr.bf16.mxu0 %v4097_v15 }
0x1dba   :  { %3749 = vmatpush3.bf16.msra.mxu0 %v3812_v55 }
0x1dbb   :  { %3750 = vmatprep.subr.bf16.mxu0 %v4097_v15 }
0x1dbe   :  { %3751 = vmatpush3.bf16.msra.mxu0 %v3813_v32 }
0x1e71   :  { %v2812_v4 = vpop.f32.mrf.mxu0 }
0x1e72   :  { %v2819_v5 = vadd.f32 %v2812_v4, %v2549_v36 }
0x1e73   :  { %v3734_v42 = vpop.f32.mrf.mxu0 }
0x1e74   :  { %v2827_v6 = vadd.f32 %v3329_v51, %v2819_v5 }
0x1e75   :  { %v2815_v10 = vpop.f32.mrf.mxu0 }
0x1e76   :  { %v2820_v11 = vadd.f32 %v2815_v10, %v2550_v41  ;;  %v2829_v12 = vadd.f32 %v2827_v6, %v4554_v8 }
0x1e77   :  { %v3735_v13 = vpop.f32.mrf.mxu0 }
0x1e78   :  { %v2828_v16 = vadd.f32 %v3329_v51, %v2820_v11  ;;  %v2831_v17 = vsel %vm162_vm0, %v2829_v12, 0.0 }
0x1e79   :  { %2832 = vadd.xlane.f32.xlu1 %v2831_v17 }
0x1e7a   :  { %v2830_v18 = vadd.f32 %v2828_v16, %v4556_v9  ;;  %v3808_v9 = vld [vmem:[%s4864_s10 + $0x18] sm:$0xff]   ;;  %v3336_v16 = vld [vmem:[%s4867_s13 + $0x1] ss:$0 sm:$0xff] }
0x1e7b   :  { %3737 = vmatpush3.bf16.msra.mxu1 %v3808_v9 }
0x1e7c   :  { %v2834_v25 = vsel %vm162_vm0, %v2830_v18, 0.0  ;;  %3738 = vmatprep.subr.bf16.mxu1 %v4097_v15 }
0x1e7d   :  { %2835 = vadd.xlane.f32.xlu0 %v2834_v25 }
0x1e7f   :  { %3739 = vmatpush3.bf16.msra.mxu1 %v3809_v37 }
0x1e80   :  { %3756 = vmatprep.subr.bf16.mxu1 %v4097_v15 }
0x1f02   :  { %v2833_v20 = vpop.xlane.xlu1 %2832 }
0x1f03   :  { %v2837_v21 = vmul.f32 0.03125, %v2833_v20 }
0x1f05   :  { %v2839_v22 = vsub.f32 %v2829_v12, %v2837_v21 }
0x1f06   :  { %v2836_v23 = vpop.xlane.xlu0 %2835 }
0x1f07   :  { %v2838_v24 = vmul.f32 0.03125, %v2836_v23  ;;  %v2841_v26 = vmul.f32 %v2839_v22, %v2839_v22 }
0x1f09   :  { %v2840_v27 = vsub.f32 %v2830_v18, %v2838_v24  ;;  %v2843_v29 = vsel %vm162_vm0, %v2841_v26, 0.0 }
0x1f0a   :  { %2844 = vadd.xlane.f32.xlu0 %v2843_v29 }
0x1f0b   :  { %v2842_v8 = vmul.f32 %v2840_v27, %v2840_v27 }
0x1f0d   :  { %v2846_v36 = vsel %vm162_vm0, %v2842_v8, 0.0 }
0x1f0e   :  { %2847 = vadd.xlane.f32.xlu1 %v2846_v36 }
0x1f93   :  { %v2845_v39 = vpop.xlane.xlu0 %2844 }
0x1f94   :  { %v2849_v40 = vmul.f32 0.03125, %v2845_v39 }
0x1f96   :  { %v2851_v41 = vadd.f32 1e-12, %v2849_v40 }
0x1f97   :  { %v2848_v47 = vpop.xlane.xlu1 %2847 }
0x1f98   :  { %3898 = vrsqrt.f32 %v2851_v41  ;;  %v2850_v43 = vmul.f32 0.03125, %v2848_v47 }
0x1f9a   :  { %v2852_v44 = vadd.f32 1e-12, %v2850_v43 }
0x1f9c   :  { %3900 = vrsqrt.f32 %v2852_v44  ;;  %v3814_v44 = vld [vmem:[#allocation13 + $0x8] sm:$0xff]  }
0x1fa5   :  { %v3899_v45 = vpop.eup %3898 }
0x1fa6   :  { %v2855_v46 = vmul.f32 %v3899_v45, %v2839_v22  ;;  %v3815_v45 = vld [vmem:[#allocation13] sm:$0xff]  }
0x1fa8   :  { %v2863_v28 = vmul.f32 %v3330_v48, %v2855_v46 }
0x1fa9   :  { %v3901_v49 = vpop.eup %3900 }
0x1faa   :  { %v2856_v7 = vmul.f32 %v3901_v49, %v2840_v27  ;;  %v2871_v38 = vadd.f32 %v3331_v50, %v2863_v28 }
0x1fac   :  { %v2864_v53 = vmul.f32 %v3330_v48, %v2856_v7 }
0x1fae   :  { %v2872_v34 = vadd.f32 %v3331_v50, %v2864_v53 }
0x1fb0   :  { %v2873_v33 = vpack.c.bf16 %v2872_v34, %v2871_v38 }
0x1fb2   :  { %3741 = vmatmul.mubr.msk.bf16.vlgmr.msra.gmra.mxu1 %vm162_vm0, %v2873_v33 }
0x1fb3   :  { %3760 = vmatprep.mubr.msk.bf16.mxu1 %vm4098_vm1, %v4097_v15  ;;  %3757 = vmatpush3.bf16.msra.mxu1 %v3814_v44 }
0x1fb4   :  { %3758 = vmatprep.subr.bf16.mxu1 %v4097_v15 }
0x1fb7   :  { %3759 = vmatpush3.bf16.msra.mxu1 %v3815_v45 }
0x1fb8   :  { %3764 = vmatprep.subr.bf16.mxu1 %v4097_v15 }
0x2072   :  { %v2929_v57 = vpop.f32.mrf.mxu1 }
0x2073   :  { %v2930_v58 = vadd.f32 %v3332_v56, %v2929_v57 }
0x2074   :  { %v3742_v59 = vpop.f32.mrf.mxu1 }
0x2075   :  { %v2938_v14 = vmul.f32 0.044715, %v2930_v58  ;;  %v2936_v42 = vmul.f32 0.5, %v2930_v58 }
0x2076   :  { %v2932_v60 = vpop.f32.mrf.mxu1 }
0x2077   :  { %v2940_v61 = vmul.f32 %v2938_v14, %v2930_v58  ;;  %v2933_v62 = vadd.f32 %v3332_v56, %v2932_v60 }
0x2078   :  { %v3743_v63 = vpop.f32.mrf.mxu1 }
0x2079   :  { %v2942_v0 = vmul.f32 %v2940_v61, %v2930_v58  ;;  %v2939_v1 = vmul.f32 0.044715, %v2933_v62  ;;  %v2937_v6 = vmul.f32 0.5, %v2933_v62 }
0x207b   :  { %v2944_v2 = vadd.f32 %v2942_v0, %v2930_v58  ;;  %v2941_v30 = vmul.f32 %v2939_v1, %v2933_v62  ;;  %v3816_v0 = vld [vmem:[%s4872_s18 + $0x8] sm:$0xff]   ;;  %v3817_v1 = vld [vmem:[%s4872_s18] sm:$0xff]   ;;  %s4109_s18 = smov [#allocation14]  }
0x207c   :  { %s3225_s9 = sshll.u32 %s4109_s18, 4  ;;  %s3226_s9 = int_to_ptr.vmem [resolvable:$true] %s3225_s9 }
0x207d   :  { %v2946_v52 = vmul.f32 0.7978846, %v2944_v2  ;;  %v2943_v3 = vmul.f32 %v2941_v30, %v2933_v62  ;;  %v3344_v2 = vld [vmem:[%s4871_s17] ss:$0 sm:$0xff]  ;;  %s4054_s17 = scalar_lea.vmem %s3226_s9, 32  ;;  %p4059_p8 = scmp.lt.s32.totalorder %s3226_s9, %s3226_s9 }
0x207e   :  { %p4055_p7 = scmp.ne.s32.totalorder %s3226_s9, %s4054_s17  ;;  %p4060_p9 = scmp.lt.s32.totalorder %s4054_s17, %s4054_s17 }
0x207f   :  { %3902 = vtanh.f32 %v2946_v52  ;;  %v2945_v35 = vadd.f32 %v2943_v3, %v2933_v62 }
0x2080   :  { %p4061_p10 = por %p4060_p9, %p4059_p8 }
0x2081   :  { %v2947_v54 = vmul.f32 0.7978846, %v2945_v35 }
0x2082   :  { %p4062_p11 = pnand %p4061_p10, %p4055_p7 }
0x2083   :  { %3904 = vtanh.f32 %v2947_v54 }
0x208c   :  { %v3903_v51 = vpop.eup %3902 }
0x208d   :  { %v2950_v4 = vadd.f32 1.0, %v3903_v51 }
0x208f   :  { %v2952_v11 = vmul.f32 %v2950_v4, %v2936_v42 }
0x2090   :  { %v3905_v5 = vpop.eup %3904 }
0x2091   :  { %v2951_v10 = vadd.f32 1.0, %v3905_v5 }
0x2093   :  { %v2953_v12 = vmul.f32 %v2951_v10, %v2937_v6 }
0x2095   :  { %v2954_v13 = vpack.c.bf16 %v2953_v12, %v2952_v11 }
0x2097   :  { %3753 = vmatmul.mubr.msk.bf16.vlgmr.msra.gmra.mxu0 %vm1553_vm4, %v2954_v13 }
0x2157   :  { %v3022_v17 = vpop.f32.mrf.mxu0 }
0x2158   :  { %v3023_v18 = vadd.f32 %v3336_v16, %v3022_v17 }
0x2159   :  { %v3754_v25 = vpop.f32.mrf.mxu0 }
0x215a   :  { %v3029_v20 = vadd.f32 %v3023_v18, %v2871_v38  ;;  %v3342_v38 = vld [vmem:[%s4868_s14 + $0x1] ss:$0 sm:$0xff] }
0x215b   :  { %v3025_v21 = vpop.f32.mrf.mxu0 }
0x215c   :  { %v3026_v22 = vadd.f32 %v3336_v16, %v3025_v21  ;;  %v3031_v23 = vsel %vm162_vm0, %v3029_v20, 0.0 }
0x215d   :  { %3032 = vadd.xlane.f32.xlu1 %v3031_v23  ;;  %v3755_v24 = vpop.f32.mrf.mxu0 }
0x215e   :  { %v3030_v26 = vadd.f32 %v3026_v22, %v2872_v34 }
0x2160   :  { %v3034_v27 = vsel %vm162_vm0, %v3030_v26, 0.0 }
0x2161   :  { %3035 = vadd.xlane.f32.xlu0 %v3034_v27 }
0x21e6   :  { %v3033_v29 = vpop.xlane.xlu1 %3032 }
0x21e7   :  { %v3037_v8 = vmul.f32 0.03125, %v3033_v29 }
0x21e9   :  { %v3039_v36 = vsub.f32 %v3029_v20, %v3037_v8 }
0x21ea   :  { %v3036_v9 = vpop.xlane.xlu0 %3035 }
0x21eb   :  { %v3038_v37 = vmul.f32 0.03125, %v3036_v9  ;;  %v3041_v39 = vmul.f32 %v3039_v36, %v3039_v36 }
0x21ed   :  { %v3040_v40 = vsub.f32 %v3030_v26, %v3038_v37  ;;  %v3043_v41 = vsel %vm162_vm0, %v3041_v39, 0.0 }
0x21ee   :  { %3044 = vadd.xlane.f32.xlu1 %v3043_v41 }
0x21ef   :  { %v3042_v47 = vmul.f32 %v3040_v40, %v3040_v40 }
0x21f1   :  { %v3046_v43 = vsel %vm162_vm0, %v3042_v47, 0.0 }
0x21f2   :  { %3047 = vadd.xlane.f32.xlu0 %v3046_v43 }
0x2277   :  { %v3045_v46 = vpop.xlane.xlu1 %3044 }
0x2278   :  { %v3049_v48 = vmul.f32 0.03125, %v3045_v46 }
0x227a   :  { %v3051_v49 = vadd.f32 1e-12, %v3049_v48 }
0x227b   :  { %v3048_v7 = vpop.xlane.xlu0 %3047 }
0x227c   :  { %3906 = vrsqrt.f32 %v3051_v49  ;;  %v3050_v28 = vmul.f32 0.03125, %v3048_v7 }
0x227e   :  { %v3052_v50 = vadd.f32 1e-12, %v3050_v28 }
0x2280   :  { %3908 = vrsqrt.f32 %v3052_v50 }
0x2289   :  { %v3907_v53 = vpop.eup %3906 }
0x228a   :  { %v3055_v34 = vmul.f32 %v3907_v53, %v3039_v36 }
0x228c   :  { %v3063_v33 = vmul.f32 %v3342_v38, %v3055_v34 }
0x228d   :  { %v3909_v31 = vpop.eup %3908 }
0x228e   :  { %v3056_v55 = vmul.f32 %v3909_v31, %v3040_v40  ;;  %v3071_v56 = vadd.f32 %v3343_v19, %v3063_v33 }
0x2290   :  { %v3064_v32 = vmul.f32 %v3342_v38, %v3056_v55  ;;  %v3077_v58 = vpack.c.bf16 %v3071_v56, %v3071_v56 }
0x2292   :  { %v3072_v57 = vadd.f32 %v3343_v19, %v3064_v32  ;;  %v3088_v60 = vunpack.c.l.b16 %v3077_v58 }
0x2294   :  { %v3078_v59 = vpack.c.bf16 %v3072_v57, %v3072_v57 }
0x2296   :  { %v3089_v14 = vunpack.c.l.b16 %v3078_v59 }
0x2298   :  { %v3090_v61 = vrot.slane %v3089_v14, 7 }
0x229a   :  { %v3092_v62 = vsel %vm3091_vm5, %v3090_v61, %v3088_v60 }
0x229b   :  { %v3093_v63 = vpack.c.b16 %v3092_v62, %v3092_v62 }
0x229d   :  { %3761 = vmatmul.mubr.msk.bf16.vlgmr.msra.gmra.mxu1 %vm162_vm0, %v3093_v63 }
0x229e   :  { %3768 = vmatprep.mubr.msk.bf16.mxu1 %vm4098_vm1, %v4097_v15  ;;  %3765 = vmatpush3.bf16.msra.mxu1 %v3816_v0 }
0x229f   :  { %3766 = vmatprep.subr.bf16.mxu1 %v4097_v15  ;;  %v3348_v15 = vld [vmem:[%s4873_s19] ss:$0 sm:$0xff] }
0x22a2   :  { %3767 = vmatpush3.bf16.msra.mxu1 %v3817_v1 }
0x235d   :  { %v3143_v30 = vpop.f32.mrf.mxu1 }
0x235e   :  { %v3144_v52 = vadd.f32 %v3344_v2, %v3143_v30 }
0x235f   :  { %v3762_v3 = vpop.f32.mrf.mxu1 }
0x2360   :  { %3910 = vtanh.f32 %v3144_v52 }
0x2361   :  { %v3146_v35 = vpop.f32.mrf.mxu1 }
0x2363   :  { %v3763_v54 = vpop.f32.mrf.mxu1 }
0x236d   :  { %v3911_v51 = vpop.eup %3910 }
0x236e   :  { %v3154_v4 = vpack.c.bf16 %v3911_v51, %v3911_v51 }
0x2370   :  { %3769 = vmatmul.mubr.msk.bf16.vlgmr.msra.gmra.mxu1 %vm162_vm0, %v3154_v4 }
0x2430   :  { %v3211_v5 = vpop.f32.mrf.mxu1 }
0x2431   :  { %v3212_v42 = vadd.f32 %v3348_v15, %v3211_v5 }
0x2432   :  { %v3770_v6 = vpop.f32.mrf.mxu1 }
0x2433   :  { %3218 = vst.msk [vmem:[#allocation14] sm:$0x3] %vm3217_vm6, %v3212_v42 }
0x2434   :  { %v3214_v10 = vpop.f32.mrf.mxu1 }
0x2435   :  { %4065 = shalt.err (!%p4062_p11)
}
0x2436   :  { %3228 = dma.vmem_to_hbm [thread:$0]  %s3226_s9, 32, %s4874_s20, [#allocation4]   ;;  %v3771_v11 = vpop.f32.mrf.mxu1 }
0x2437   :  { %4082 = dma.done.wait [#allocation4], 32  }
0x2438   :  { %4083 = vsyncadd [#allocation4], 4294967264 }
0x2439   :  { %3232 = vsyncpa [#allocation3], 1 }
0x243a   :  { %3233 = vsyncpa [#allocation6], 1 }
0x243b   :  { %3234 = vsyncpa [#allocation9], 1 }
0x243c   :  { %3235 = vsyncpa [#allocation12], 1 }
0x243d   :  { %3236 = vsyncpa [#allocation4], 1 }

</bundles_post_ra>
